<compile_context>
chip_gen: v7x
topology: tpu7x:2x2x1
jax: 0.10.0
libtpu: 0.0.40
codegen_flags: <defaults>
</compile_context>

<pallas_src>
import functools

import jax
import jax.numpy as jnp
from jax import lax
from jax.experimental import pallas as pl
from jax.experimental.pallas import tpu as pltpu

_LANES = 128


def _l2_normalize(z):
    # F.normalize(p=2, dim=-1): z / max(||z||, 1e-12) -> z * rsqrt(max(sumsq, 1e-24))
    ss = jnp.sum(z * z, axis=-1, keepdims=True)
    return z * lax.rsqrt(jnp.maximum(ss, 1e-24))


# ----------------------------------------------------------------------------
# Fused kernel: one grid step == one full molecule batch (B graphs, N nodes)
# ----------------------------------------------------------------------------
def _fused_diffpool_kernel(ids_ref, adj_ref, mask_ref, slab_ref, out_ref,
                           *, offs, batch_size):
    def slab(name):
        o, r, c = offs[name]            # python ints -> static slice (zero-cost view)
        return slab_ref[o:o + r, :c]

    # ---- 1) atom-type embedding: one-hot (ids == const iota) @ table (MXU) ----
    ids = ids_ref[0]                                     # (N, 1) f32 atom-type ids
    onehot = (slab('type_iota') == ids).astype(jnp.float32)          # (N, T)
    h = jnp.dot(onehot, slab('emb'), preferred_element_type=jnp.float32)

    # ---- hoisted adjacency-derived quantities (shared by all 5 GraphSage layers) ----
    adj = adj_ref[0]                                     # (N, N)
    deg = jnp.maximum(jnp.sum(adj, axis=1, keepdims=True), 1.0)
    inv_deg = 1.0 / deg                                  # exact; computed once, reused 5x

    def sage(x, name, relu, bn, residual):
        # GraphSageLayer (mean aggregator + NodeApply); concat replaced by split weights:
        #   z = x @ W_self + mean_neigh(x) @ W_neigh + b ; l2norm ; act ; bn ; +res
        ws, wn, b = slab(name + '_ws'), slab(name + '_wn'), slab(name + '_b')
        c = jnp.dot(adj, x, preferred_element_type=jnp.float32) * inv_deg
        z = (jnp.dot(x, ws, preferred_element_type=jnp.float32)
             + jnp.dot(c, wn, preferred_element_type=jnp.float32) + b)
        z = _l2_normalize(z)
        if relu:
            z = jnp.maximum(z, 0.0)
        if bn:
            # BatchNorm1d over ALL nodes of the batch (training-mode stats, no affine).
            mu = jnp.mean(z, axis=0, keepdims=True)
            d = z - mu
            var = jnp.mean(d * d, axis=0, keepdims=True)
            z = d * lax.rsqrt(var + 1e-5)
        if residual:
            z = z + x
        return z

    # ---- 2) GraphSage stack before pooling (relu+bn, relu+bn, linear; residual) ----
    h = sage(h, 'sb0', True, True, True)
    h = sage(h, 'sb1', True, True, True)
    g_embedding = sage(h, 'sb2', False, False, True)
    # TODO(synk): dgl.sum_nodes readout of g_embedding is only consumed when cat=True;
    # with cat=False / num_aggs=1 it does not reach the output, so it is skipped.

    # ---- 3) first DiffPool layer ----
    feat = sage(g_embedding, 'dpf', True, False, False)       # (N, H)
    assign = sage(g_embedding, 'dpp', True, False, False)     # (N, A)

    # masked softmax (memory_efficient=False): softmax(logits*mask), re-mask, renormalize
    # (+1e-13).  Exact divisions (no approx reciprocal) for parity with the reference.
    mask = mask_ref[0]                                   # (N, A)
    logits = assign * mask
    logits = logits - jnp.max(logits, axis=1, keepdims=True)
    e = jnp.exp(logits)
    p = e / jnp.sum(e, axis=1, keepdims=True)
    p = p * mask
    p = p / (jnp.sum(p, axis=1, keepdims=True) + 1e-13)

    # h_pool = S^T @ feat ; adj_pool = S^T @ A @ S  — S transposed ONCE and reused
    p_t = jnp.transpose(p)                                            # (A, N)
    h_pool = jnp.dot(p_t, feat, preferred_element_type=jnp.float32)   # (A, H)
    a_s = jnp.dot(adj, p, preferred_element_type=jnp.float32)         # (N, A)
    adj_pool = jnp.dot(p_t, a_s, preferred_element_type=jnp.float32)  # (A, A)

    # ---- 4) batch2tensor feature scaling, kept flat (adj_pool is block-diagonal) ----
    assign_dim = mask.shape[1]
    npp = assign_dim // batch_size                       # pooled nodes per graph
    x = h_pool * (1.0 / float(npp) ** 0.5)               # sqrt(1/npp)

    msame = slab('msame')                                # (A, A) per-slot selection (const)

    def dense_sage(x, name):
        # DenseGraphSage flat: hk = relu(l2norm(W(adj_pool @ x))) [+x] ; BN(n_pool_nodes)
        w, b = slab(name + '_w'), slab(name + '_b')
        fout = w.shape[1]
        h_n = jnp.dot(adj_pool, x, preferred_element_type=jnp.float32)
        hk = jnp.dot(h_n, w, preferred_element_type=jnp.float32) + b
        hk = _l2_normalize(hk)
        hk = jnp.maximum(hk, 0.0)
        if x.shape[1] == fout:                           # residual gated on shapes
            hk = x + hk
        # BatchNorm1d(n_pool_nodes) on (B, npp, F): stats over (batch, feature) per slot.
        denom = 1.0 / float(batch_size * fout)
        rs = jnp.sum(hk, axis=1, keepdims=True)                       # (A, 1)
        mu = jnp.dot(msame, rs, preferred_element_type=jnp.float32) * denom
        d = hk - mu
        vs = jnp.sum(d * d, axis=1, keepdims=True)
        var = jnp.dot(msame, vs, preferred_element_type=jnp.float32) * denom
        return d * lax.rsqrt(var + 1e-5)

    # ---- 5) dense GraphSage stack after pooling ----
    x = dense_sage(x, 'da0')
    x = dense_sage(x, 'da1')
    x = dense_sage(x, 'da2')

    # ---- 6) readout (sum over pooled nodes per graph); pred head runs in the wrapper ----
    readout = jnp.dot(slab('bsum'), x, preferred_element_type=jnp.float32)  # (B, EMB)
    out_ref[0] = readout


# ----------------------------------------------------------------------------
# Parameter construction (deterministic, synthetic — no checkpoint loading)
# ----------------------------------------------------------------------------
def _xavier(key, fan_in, fan_out):
    gain = jnp.sqrt(2.0)  # nn.init.calculate_gain('relu')
    bound = gain * jnp.sqrt(6.0 / (fan_in + fan_out))
    # stored as (in, out) == transpose of torch's nn.Linear weight
    return jax.random.uniform(key, (fan_in, fan_out), jnp.float32, -bound, bound)


def make_params(key, num_atom_type, hidden, emb_dim, assign_dim, n_layers=3):
    keys = jax.random.split(key, 16)
    params = {}
    params['emb'] = jax.random.normal(keys[0], (num_atom_type, hidden), jnp.float32)

    def split_sage(k, fin, fout):
        # Bundler: Linear(2*fin, fout) applied to cat([h, c]); split for concat-free matmuls.
        w = _xavier(k, 2 * fin, fout)
        return {'ws': w[:fin], 'wn': w[fin:], 'b': jnp.zeros((1, fout), jnp.float32)}

    sage_before = []
    dims = [hidden] * (n_layers - 1) + [emb_dim]
    for i, fout in enumerate(dims):
        sage_before.append(split_sage(keys[1 + i], hidden, fout))
    params['sage_before'] = sage_before

    params['dp_feat'] = split_sage(keys[5], emb_dim, hidden)
    params['dp_pool'] = split_sage(keys[6], emb_dim, assign_dim)

    dense_after = []
    dims = [hidden] * (n_layers - 1) + [emb_dim]
    fin = hidden
    for i, fout in enumerate(dims):
        dense_after.append({'w': _xavier(keys[7 + i], fin, fout),
                            'b': jnp.zeros((1, fout), jnp.float32)})
        fin = fout
    params['dense_after'] = dense_after

    params['pred'] = {'w': _xavier(keys[12], emb_dim, 1),
                      'b': jnp.zeros((1, 1), jnp.float32)}
    return params


# ----------------------------------------------------------------------------
# Weight-slab packing: all small tensors -> one lane-aligned (rows, 128) f32 buffer
# ----------------------------------------------------------------------------
def _pack_weight_slab(params, n_nodes, batch_size, assign_dim):
    n_types = params['emb'].shape[0]
    npp = assign_dim // batch_size

    tensors = {}
    # constant type iota for the one-hot embedding matmul (kept out of the grid loop)
    tensors['type_iota'] = jnp.tile(
        jnp.arange(n_types, dtype=jnp.float32)[None, :], (n_nodes, 1))
    tensors['emb'] = params['emb']
    for i, lp in enumerate(params['sage_before']):
        tensors[f'sb{i}_ws'] = lp['ws']
        tensors[f'sb{i}_wn'] = lp['wn']
        tensors[f'sb{i}_b'] = lp['b']
    for nm, lp in (('dpf', params['dp_feat']), ('dpp', params['dp_pool'])):
        tensors[f'{nm}_ws'] = lp['ws']
        tensors[f'{nm}_wn'] = lp['wn']
        tensors[f'{nm}_b'] = lp['b']
    for i, lp in enumerate(params['dense_after']):
        tensors[f'da{i}_w'] = lp['w']
        tensors[f'da{i}_b'] = lp['b']
    # constant selection matrices (precomputed here, not regenerated per grid step)
    slot = jnp.arange(assign_dim, dtype=jnp.int32) % npp
    tensors['msame'] = (slot[:, None] == slot[None, :]).astype(jnp.float32)
    graph_of = jnp.arange(assign_dim, dtype=jnp.int32) // npp
    tensors['bsum'] = (jnp.arange(batch_size, dtype=jnp.int32)[:, None]
                       == graph_of[None, :]).astype(jnp.float32)

    blocks, offs, off = [], {}, 0
    for name, t in tensors.items():
        t = jnp.asarray(t, jnp.float32)
        r, c = t.shape
        rp = -(-r // 8) * 8                              # pad rows to sublane multiple
        blk = jnp.zeros((rp, _LANES), jnp.float32).at[:r, :c].set(t)
        offs[name] = (off, r, c)
        blocks.append(blk)
        off += rp
    return jnp.concatenate(blocks, axis=0), offs


# ----------------------------------------------------------------------------
# Full forward pass: one pallas_call gridded over independent molecule batches
# ----------------------------------------------------------------------------
def diffpool_net_forward(params, node_ids, adj, assign_mask, batch_size):
    """node_ids: (NB, N) int, adj: (NB, N, N), assign_mask: (NB, N, A) -> (NB, B, 1)."""
    nb, n_nodes = node_ids.shape
    assign_dim = assign_mask.shape[-1]
    emb_dim = params['dense_after'][-1]['w'].shape[1]

    slab, offs = _pack_weight_slab(params, n_nodes, batch_size, assign_dim)

    ids3 = node_ids.astype(jnp.float32).reshape(nb, n_nodes, 1)
    adjf = adj.astype(jnp.float32)
    maskf = assign_mask.astype(jnp.float32)

    kernel = functools.partial(_fused_diffpool_kernel, offs=offs, batch_size=batch_size)
    readout = pl.pallas_call(
        kernel,
        out_shape=jax.ShapeDtypeStruct((nb, batch_size, emb_dim), jnp.float32),
        grid=(nb,),
        in_specs=[
            pl.BlockSpec((1, n_nodes, 1), lambda i: (i, 0, 0)),
            pl.BlockSpec((1, n_nodes, n_nodes), lambda i: (i, 0, 0)),
            pl.BlockSpec((1, n_nodes, assign_dim), lambda i: (i, 0, 0)),
            # constant block index -> weight slab DMA'd once, VMEM-resident across grid
            pl.BlockSpec(slab.shape, lambda i: (0, 0)),
        ],
        out_specs=pl.BlockSpec((1, batch_size, emb_dim), lambda i: (i, 0, 0)),
        compiler_params=pltpu.CompilerParams(
            dimension_semantics=("parallel",)),        # shards batches over v7x's 2 TCs
    )(ids3, adjf, maskf, slab)

    # Lane-dense kernel output (B, EMB); trivial 32->1 prediction head stays in XLA.
    ypred = jnp.einsum('nbe,eo->nbo', readout, params['pred']['w']) + params['pred']['b']
    return ypred


# ----------------------------------------------------------------------------
# Main
# ----------------------------------------------------------------------------
if __name__ == "__main__":
    NUM_ATOM_TYPE = 8
    HIDDEN = 32
    EMB = 32
    N_LAYERS = 3
    BATCH = 2                       # graphs per molecule batch (module's batch_size)
    NODES_PER_GRAPH = 8
    N = BATCH * NODES_PER_GRAPH
    ASSIGN_DIM = 8                  # total pooled nodes per batch (divisible by BATCH)
    NUM_BATCHES = 4                 # independent batches folded into one launch (grid axis)

    key = jax.random.PRNGKey(0)
    k_par, k_data = jax.random.split(key)
    params = make_params(k_par, NUM_ATOM_TYPE, HIDDEN, EMB, ASSIGN_DIM, N_LAYERS)

    # block-diagonal assignment mask (each graph can only assign to its own clusters)
    per_graph_assign = ASSIGN_DIM // BATCH
    assign_mask_1 = jax.scipy.linalg.block_diag(
        *[jnp.ones((NODES_PER_GRAPH, per_graph_assign), jnp.float32) for _ in range(BATCH)]
    ).astype(jnp.float32)                                            # (N, ASSIGN_DIM)

    ids_list, adj_list = [], []
    for b in range(NUM_BATCHES):
        kb = jax.random.fold_in(k_data, b)
        k_ids, k_adj = jax.random.split(kb)
        ids_list.append(jax.random.randint(k_ids, (N,), 0, NUM_ATOM_TYPE, dtype=jnp.int32))
        # block-diagonal symmetric adjacency (NO self-loops: the mean aggregator
        # averages over neighbors only, like DGL).
        blocks = []
        for g in range(BATCH):
            kk = jax.random.fold_in(k_adj, g)
            a = (jax.random.uniform(kk, (NODES_PER_GRAPH, NODES_PER_GRAPH)) < 0.4
                 ).astype(jnp.float32)
            a = jnp.maximum(a, a.T)
            a = a * (1.0 - jnp.eye(NODES_PER_GRAPH))
            blocks.append(a)
        adj_list.append(jax.scipy.linalg.block_diag(*blocks).astype(jnp.float32))

    node_ids = jnp.stack(ids_list)                                   # (NB, N)
    adj = jnp.stack(adj_list)                                        # (NB, N, N)
    assign_mask = jnp.tile(assign_mask_1[None], (NUM_BATCHES, 1, 1))  # (NB, N, A)

    ypred = diffpool_net_forward(params, node_ids, adj, assign_mask, BATCH)
    ypred = jax.block_until_ready(ypred)
    assert ypred.shape == (NUM_BATCHES, BATCH, 1)
    assert bool(jnp.all(jnp.isfinite(ypred)))
    print("KERNEL_OK")
</pallas_src>

<mosaic_0001>
module attributes {stable_mosaic.version = 11 : i64} {
  func.func @_fused_diffpool_kernel(%arg0: i32, %arg1: memref<1x16x1xf32, #tpu.memory_space<vmem>>, %arg2: memref<1x16x16xf32, #tpu.memory_space<vmem>>, %arg3: memref<1x16x8xf32, #tpu.memory_space<vmem>>, %arg4: memref<520x128xf32, #tpu.memory_space<vmem>>, %arg5: memref<1x2x32xf32, #tpu.memory_space<vmem>>) attributes {dimension_semantics = [#tpu.dimension_semantics<parallel>], iteration_bounds = array<i64: 4>, scalar_prefetch = 0 : i64, scratch_operands = 0 : i64, tpu.core_type = #tpu.core_type<tc>, window_params = [{transform_indices = @transform_0, window_bounds = array<i64: 1, 16, 1>}, {transform_indices = @transform_1, window_bounds = array<i64: 1, 16, 16>}, {transform_indices = @transform_2, window_bounds = array<i64: 1, 16, 8>}, {pipeline_mode = #tpu.pipeline_mode<synchronous>, transform_indices = @transform_3, window_bounds = array<i64: 520, 128>}, {transform_indices = @transform_4, window_bounds = array<i64: 1, 2, 32>}]} {
    %c0 = arith.constant 0 : index
    %c0_0 = arith.constant 0 : index
    %c0_1 = arith.constant 0 : index
    %0 = vector.load %arg1[%c0, %c0_0, %c0_1] : memref<1x16x1xf32, #tpu.memory_space<vmem>>, vector<1x16x1xf32>
    %1 = vector.shape_cast %0 : vector<1x16x1xf32> to vector<16x1xf32>
    %c0_2 = arith.constant 0 : index
    %c0_3 = arith.constant 0 : index
    %2 = vector.load %arg4[%c0_2, %c0_3] : memref<520x128xf32, #tpu.memory_space<vmem>>, vector<16x8xf32>
    %3 = vector.broadcast %1 : vector<16x1xf32> to vector<16x8xf32>
    %4 = arith.cmpf oeq, %2, %3 : vector<16x8xf32>
    %5 = arith.extui %4 : vector<16x8xi1> to vector<16x8xi32>
    %6 = arith.sitofp %5 : vector<16x8xi32> to vector<16x8xf32>
    %c16 = arith.constant 16 : index
    %c0_4 = arith.constant 0 : index
    %7 = vector.load %arg4[%c16, %c0_4] : memref<520x128xf32, #tpu.memory_space<vmem>>, vector<8x32xf32>
    %cst = arith.constant dense<0.000000e+00> : vector<16x32xf32>
    %8 = tpu.matmul %6, %7, %cst {dimension_numbers = #tpu.dot_dimension_numbers<[1], [0], [0], [1], [0, 0, 1, 1], [], []>} : vector<16x8xf32>, vector<8x32xf32>, vector<16x32xf32> -> vector<16x32xf32>
    %c0_5 = arith.constant 0 : index
    %c0_6 = arith.constant 0 : index
    %c0_7 = arith.constant 0 : index
    %9 = vector.load %arg2[%c0_5, %c0_6, %c0_7] : memref<1x16x16xf32, #tpu.memory_space<vmem>>, vector<1x16x16xf32>
    %10 = vector.shape_cast %9 : vector<1x16x16xf32> to vector<16x16xf32>
    %cst_8 = arith.constant dense<0.000000e+00> : vector<16xf32>
    %11 = vector.multi_reduction <add>, %10, %cst_8 [1] : vector<16x16xf32> to vector<16xf32>
    %12 = vector.shape_cast %11 : vector<16xf32> to vector<16x1xf32>
    %cst_9 = arith.constant 1.000000e+00 : f32
    %13 = vector.broadcast %cst_9 : f32 to vector<16x1xf32>
    %14 = arith.maximumf %12, %13 : vector<16x1xf32>
    %cst_10 = arith.constant 1.000000e+00 : f32
    %15 = vector.broadcast %cst_10 : f32 to vector<16x1xf32>
    %16 = arith.divf %15, %14 : vector<16x1xf32>
    %c24 = arith.constant 24 : index
    %c0_11 = arith.constant 0 : index
    %17 = vector.load %arg4[%c24, %c0_11] : memref<520x128xf32, #tpu.memory_space<vmem>>, vector<32x32xf32>
    %c56 = arith.constant 56 : index
    %c0_12 = arith.constant 0 : index
    %18 = vector.load %arg4[%c56, %c0_12] : memref<520x128xf32, #tpu.memory_space<vmem>>, vector<32x32xf32>
    %c88 = arith.constant 88 : index
    %c0_13 = arith.constant 0 : index
    %19 = vector.load %arg4[%c88, %c0_13] : memref<520x128xf32, #tpu.memory_space<vmem>>, vector<1x32xf32>
    %cst_14 = arith.constant dense<0.000000e+00> : vector<16x32xf32>
    %20 = tpu.matmul %10, %8, %cst_14 {dimension_numbers = #tpu.dot_dimension_numbers<[1], [0], [0], [1], [0, 0, 1, 1], [], []>} : vector<16x16xf32>, vector<16x32xf32>, vector<16x32xf32> -> vector<16x32xf32>
    %21 = vector.broadcast %16 : vector<16x1xf32> to vector<16x32xf32>
    %22 = arith.mulf %20, %21 : vector<16x32xf32>
    %cst_15 = arith.constant dense<0.000000e+00> : vector<16x32xf32>
    %23 = tpu.matmul %8, %17, %cst_15 {dimension_numbers = #tpu.dot_dimension_numbers<[1], [0], [0], [1], [0, 0, 1, 1], [], []>} : vector<16x32xf32>, vector<32x32xf32>, vector<16x32xf32> -> vector<16x32xf32>
    %cst_16 = arith.constant dense<0.000000e+00> : vector<16x32xf32>
    %24 = tpu.matmul %22, %18, %cst_16 {dimension_numbers = #tpu.dot_dimension_numbers<[1], [0], [0], [1], [0, 0, 1, 1], [], []>} : vector<16x32xf32>, vector<32x32xf32>, vector<16x32xf32> -> vector<16x32xf32>
    %25 = arith.addf %23, %24 : vector<16x32xf32>
    %26 = vector.broadcast %19 : vector<1x32xf32> to vector<16x32xf32>
    %27 = arith.addf %25, %26 : vector<16x32xf32>
    %28 = arith.mulf %27, %27 : vector<16x32xf32>
    %cst_17 = arith.constant dense<0.000000e+00> : vector<16xf32>
    %29 = vector.multi_reduction <add>, %28, %cst_17 [1] : vector<16x32xf32> to vector<16xf32>
    %30 = vector.shape_cast %29 : vector<16xf32> to vector<16x1xf32>
    %cst_18 = arith.constant 1.000000e-24 : f32
    %31 = vector.broadcast %cst_18 : f32 to vector<16x1xf32>
    %32 = arith.maximumf %30, %31 : vector<16x1xf32>
    %33 = math.rsqrt %32 : vector<16x1xf32>
    %34 = vector.broadcast %33 : vector<16x1xf32> to vector<16x32xf32>
    %35 = arith.mulf %27, %34 : vector<16x32xf32>
    %cst_19 = arith.constant 0.000000e+00 : f32
    %36 = vector.broadcast %cst_19 : f32 to vector<16x32xf32>
    %37 = arith.maximumf %35, %36 : vector<16x32xf32>
    %cst_20 = arith.constant dense<0.000000e+00> : vector<32xf32>
    %38 = vector.multi_reduction <add>, %37, %cst_20 [0] : vector<16x32xf32> to vector<32xf32>
    %39 = vector.shape_cast %38 : vector<32xf32> to vector<1x32xf32>
    %cst_21 = arith.constant 1.600000e+01 : f32
    %40 = vector.broadcast %cst_21 : f32 to vector<1x32xf32>
    %41 = arith.divf %39, %40 : vector<1x32xf32>
    %42 = vector.broadcast %41 : vector<1x32xf32> to vector<16x32xf32>
    %43 = arith.subf %37, %42 : vector<16x32xf32>
    %44 = arith.mulf %43, %43 : vector<16x32xf32>
    %cst_22 = arith.constant dense<0.000000e+00> : vector<32xf32>
    %45 = vector.multi_reduction <add>, %44, %cst_22 [0] : vector<16x32xf32> to vector<32xf32>
    %46 = vector.shape_cast %45 : vector<32xf32> to vector<1x32xf32>
    %cst_23 = arith.constant 1.600000e+01 : f32
    %47 = vector.broadcast %cst_23 : f32 to vector<1x32xf32>
    %48 = arith.divf %46, %47 : vector<1x32xf32>
    %cst_24 = arith.constant 9.99999974E-6 : f32
    %49 = vector.broadcast %cst_24 : f32 to vector<1x32xf32>
    %50 = arith.addf %48, %49 : vector<1x32xf32>
    %51 = math.rsqrt %50 : vector<1x32xf32>
    %52 = vector.broadcast %51 : vector<1x32xf32> to vector<16x32xf32>
    %53 = arith.mulf %43, %52 : vector<16x32xf32>
    %54 = arith.addf %53, %8 : vector<16x32xf32>
    %c96 = arith.constant 96 : index
    %c0_25 = arith.constant 0 : index
    %55 = vector.load %arg4[%c96, %c0_25] : memref<520x128xf32, #tpu.memory_space<vmem>>, vector<32x32xf32>
    %c128 = arith.constant 128 : index
    %c0_26 = arith.constant 0 : index
    %56 = vector.load %arg4[%c128, %c0_26] : memref<520x128xf32, #tpu.memory_space<vmem>>, vector<32x32xf32>
    %c160 = arith.constant 160 : index
    %c0_27 = arith.constant 0 : index
    %57 = vector.load %arg4[%c160, %c0_27] : memref<520x128xf32, #tpu.memory_space<vmem>>, vector<1x32xf32>
    %cst_28 = arith.constant dense<0.000000e+00> : vector<16x32xf32>
    %58 = tpu.matmul %10, %54, %cst_28 {dimension_numbers = #tpu.dot_dimension_numbers<[1], [0], [0], [1], [0, 0, 1, 1], [], []>} : vector<16x16xf32>, vector<16x32xf32>, vector<16x32xf32> -> vector<16x32xf32>
    %59 = vector.broadcast %16 : vector<16x1xf32> to vector<16x32xf32>
    %60 = arith.mulf %58, %59 : vector<16x32xf32>
    %cst_29 = arith.constant dense<0.000000e+00> : vector<16x32xf32>
    %61 = tpu.matmul %54, %55, %cst_29 {dimension_numbers = #tpu.dot_dimension_numbers<[1], [0], [0], [1], [0, 0, 1, 1], [], []>} : vector<16x32xf32>, vector<32x32xf32>, vector<16x32xf32> -> vector<16x32xf32>
    %cst_30 = arith.constant dense<0.000000e+00> : vector<16x32xf32>
    %62 = tpu.matmul %60, %56, %cst_30 {dimension_numbers = #tpu.dot_dimension_numbers<[1], [0], [0], [1], [0, 0, 1, 1], [], []>} : vector<16x32xf32>, vector<32x32xf32>, vector<16x32xf32> -> vector<16x32xf32>
    %63 = arith.addf %61, %62 : vector<16x32xf32>
    %64 = vector.broadcast %57 : vector<1x32xf32> to vector<16x32xf32>
    %65 = arith.addf %63, %64 : vector<16x32xf32>
    %66 = arith.mulf %65, %65 : vector<16x32xf32>
    %cst_31 = arith.constant dense<0.000000e+00> : vector<16xf32>
    %67 = vector.multi_reduction <add>, %66, %cst_31 [1] : vector<16x32xf32> to vector<16xf32>
    %68 = vector.shape_cast %67 : vector<16xf32> to vector<16x1xf32>
    %cst_32 = arith.constant 1.000000e-24 : f32
    %69 = vector.broadcast %cst_32 : f32 to vector<16x1xf32>
    %70 = arith.maximumf %68, %69 : vector<16x1xf32>
    %71 = math.rsqrt %70 : vector<16x1xf32>
    %72 = vector.broadcast %71 : vector<16x1xf32> to vector<16x32xf32>
    %73 = arith.mulf %65, %72 : vector<16x32xf32>
    %cst_33 = arith.constant 0.000000e+00 : f32
    %74 = vector.broadcast %cst_33 : f32 to vector<16x32xf32>
    %75 = arith.maximumf %73, %74 : vector<16x32xf32>
    %cst_34 = arith.constant dense<0.000000e+00> : vector<32xf32>
    %76 = vector.multi_reduction <add>, %75, %cst_34 [0] : vector<16x32xf32> to vector<32xf32>
    %77 = vector.shape_cast %76 : vector<32xf32> to vector<1x32xf32>
    %cst_35 = arith.constant 1.600000e+01 : f32
    %78 = vector.broadcast %cst_35 : f32 to vector<1x32xf32>
    %79 = arith.divf %77, %78 : vector<1x32xf32>
    %80 = vector.broadcast %79 : vector<1x32xf32> to vector<16x32xf32>
    %81 = arith.subf %75, %80 : vector<16x32xf32>
    %82 = arith.mulf %81, %81 : vector<16x32xf32>
    %cst_36 = arith.constant dense<0.000000e+00> : vector<32xf32>
    %83 = vector.multi_reduction <add>, %82, %cst_36 [0] : vector<16x32xf32> to vector<32xf32>
    %84 = vector.shape_cast %83 : vector<32xf32> to vector<1x32xf32>
    %cst_37 = arith.constant 1.600000e+01 : f32
    %85 = vector.broadcast %cst_37 : f32 to vector<1x32xf32>
    %86 = arith.divf %84, %85 : vector<1x32xf32>
    %cst_38 = arith.constant 9.99999974E-6 : f32
    %87 = vector.broadcast %cst_38 : f32 to vector<1x32xf32>
    %88 = arith.addf %86, %87 : vector<1x32xf32>
    %89 = math.rsqrt %88 : vector<1x32xf32>
    %90 = vector.broadcast %89 : vector<1x32xf32> to vector<16x32xf32>
    %91 = arith.mulf %81, %90 : vector<16x32xf32>
    %92 = arith.addf %91, %54 : vector<16x32xf32>
    %c168 = arith.constant 168 : index
    %c0_39 = arith.constant 0 : index
    %93 = vector.load %arg4[%c168, %c0_39] : memref<520x128xf32, #tpu.memory_space<vmem>>, vector<32x32xf32>
    %c200 = arith.constant 200 : index
    %c0_40 = arith.constant 0 : index
    %94 = vector.load %arg4[%c200, %c0_40] : memref<520x128xf32, #tpu.memory_space<vmem>>, vector<32x32xf32>
    %c232 = arith.constant 232 : index
    %c0_41 = arith.constant 0 : index
    %95 = vector.load %arg4[%c232, %c0_41] : memref<520x128xf32, #tpu.memory_space<vmem>>, vector<1x32xf32>
    %cst_42 = arith.constant dense<0.000000e+00> : vector<16x32xf32>
    %96 = tpu.matmul %10, %92, %cst_42 {dimension_numbers = #tpu.dot_dimension_numbers<[1], [0], [0], [1], [0, 0, 1, 1], [], []>} : vector<16x16xf32>, vector<16x32xf32>, vector<16x32xf32> -> vector<16x32xf32>
    %97 = vector.broadcast %16 : vector<16x1xf32> to vector<16x32xf32>
    %98 = arith.mulf %96, %97 : vector<16x32xf32>
    %cst_43 = arith.constant dense<0.000000e+00> : vector<16x32xf32>
    %99 = tpu.matmul %92, %93, %cst_43 {dimension_numbers = #tpu.dot_dimension_numbers<[1], [0], [0], [1], [0, 0, 1, 1], [], []>} : vector<16x32xf32>, vector<32x32xf32>, vector<16x32xf32> -> vector<16x32xf32>
    %cst_44 = arith.constant dense<0.000000e+00> : vector<16x32xf32>
    %100 = tpu.matmul %98, %94, %cst_44 {dimension_numbers = #tpu.dot_dimension_numbers<[1], [0], [0], [1], [0, 0, 1, 1], [], []>} : vector<16x32xf32>, vector<32x32xf32>, vector<16x32xf32> -> vector<16x32xf32>
    %101 = arith.addf %99, %100 : vector<16x32xf32>
    %102 = vector.broadcast %95 : vector<1x32xf32> to vector<16x32xf32>
    %103 = arith.addf %101, %102 : vector<16x32xf32>
    %104 = arith.mulf %103, %103 : vector<16x32xf32>
    %cst_45 = arith.constant dense<0.000000e+00> : vector<16xf32>
    %105 = vector.multi_reduction <add>, %104, %cst_45 [1] : vector<16x32xf32> to vector<16xf32>
    %106 = vector.shape_cast %105 : vector<16xf32> to vector<16x1xf32>
    %cst_46 = arith.constant 1.000000e-24 : f32
    %107 = vector.broadcast %cst_46 : f32 to vector<16x1xf32>
    %108 = arith.maximumf %106, %107 : vector<16x1xf32>
    %109 = math.rsqrt %108 : vector<16x1xf32>
    %110 = vector.broadcast %109 : vector<16x1xf32> to vector<16x32xf32>
    %111 = arith.mulf %103, %110 : vector<16x32xf32>
    %112 = arith.addf %111, %92 : vector<16x32xf32>
    %c240 = arith.constant 240 : index
    %c0_47 = arith.constant 0 : index
    %113 = vector.load %arg4[%c240, %c0_47] : memref<520x128xf32, #tpu.memory_space<vmem>>, vector<32x32xf32>
    %c272 = arith.constant 272 : index
    %c0_48 = arith.constant 0 : index
    %114 = vector.load %arg4[%c272, %c0_48] : memref<520x128xf32, #tpu.memory_space<vmem>>, vector<32x32xf32>
    %c304 = arith.constant 304 : index
    %c0_49 = arith.constant 0 : index
    %115 = vector.load %arg4[%c304, %c0_49] : memref<520x128xf32, #tpu.memory_space<vmem>>, vector<1x32xf32>
    %cst_50 = arith.constant dense<0.000000e+00> : vector<16x32xf32>
    %116 = tpu.matmul %10, %112, %cst_50 {dimension_numbers = #tpu.dot_dimension_numbers<[1], [0], [0], [1], [0, 0, 1, 1], [], []>} : vector<16x16xf32>, vector<16x32xf32>, vector<16x32xf32> -> vector<16x32xf32>
    %117 = vector.broadcast %16 : vector<16x1xf32> to vector<16x32xf32>
    %118 = arith.mulf %116, %117 : vector<16x32xf32>
    %cst_51 = arith.constant dense<0.000000e+00> : vector<16x32xf32>
    %119 = tpu.matmul %112, %113, %cst_51 {dimension_numbers = #tpu.dot_dimension_numbers<[1], [0], [0], [1], [0, 0, 1, 1], [], []>} : vector<16x32xf32>, vector<32x32xf32>, vector<16x32xf32> -> vector<16x32xf32>
    %cst_52 = arith.constant dense<0.000000e+00> : vector<16x32xf32>
    %120 = tpu.matmul %118, %114, %cst_52 {dimension_numbers = #tpu.dot_dimension_numbers<[1], [0], [0], [1], [0, 0, 1, 1], [], []>} : vector<16x32xf32>, vector<32x32xf32>, vector<16x32xf32> -> vector<16x32xf32>
    %121 = arith.addf %119, %120 : vector<16x32xf32>
    %122 = vector.broadcast %115 : vector<1x32xf32> to vector<16x32xf32>
    %123 = arith.addf %121, %122 : vector<16x32xf32>
    %124 = arith.mulf %123, %123 : vector<16x32xf32>
    %cst_53 = arith.constant dense<0.000000e+00> : vector<16xf32>
    %125 = vector.multi_reduction <add>, %124, %cst_53 [1] : vector<16x32xf32> to vector<16xf32>
    %126 = vector.shape_cast %125 : vector<16xf32> to vector<16x1xf32>
    %cst_54 = arith.constant 1.000000e-24 : f32
    %127 = vector.broadcast %cst_54 : f32 to vector<16x1xf32>
    %128 = arith.maximumf %126, %127 : vector<16x1xf32>
    %129 = math.rsqrt %128 : vector<16x1xf32>
    %130 = vector.broadcast %129 : vector<16x1xf32> to vector<16x32xf32>
    %131 = arith.mulf %123, %130 : vector<16x32xf32>
    %cst_55 = arith.constant 0.000000e+00 : f32
    %132 = vector.broadcast %cst_55 : f32 to vector<16x32xf32>
    %133 = arith.maximumf %131, %132 : vector<16x32xf32>
    %c312 = arith.constant 312 : index
    %c0_56 = arith.constant 0 : index
    %134 = vector.load %arg4[%c312, %c0_56] : memref<520x128xf32, #tpu.memory_space<vmem>>, vector<32x8xf32>
    %c344 = arith.constant 344 : index
    %c0_57 = arith.constant 0 : index
    %135 = vector.load %arg4[%c344, %c0_57] : memref<520x128xf32, #tpu.memory_space<vmem>>, vector<32x8xf32>
    %c376 = arith.constant 376 : index
    %c0_58 = arith.constant 0 : index
    %136 = vector.load %arg4[%c376, %c0_58] : memref<520x128xf32, #tpu.memory_space<vmem>>, vector<1x8xf32>
    %cst_59 = arith.constant dense<0.000000e+00> : vector<16x32xf32>
    %137 = tpu.matmul %10, %112, %cst_59 {dimension_numbers = #tpu.dot_dimension_numbers<[1], [0], [0], [1], [0, 0, 1, 1], [], []>} : vector<16x16xf32>, vector<16x32xf32>, vector<16x32xf32> -> vector<16x32xf32>
    %138 = vector.broadcast %16 : vector<16x1xf32> to vector<16x32xf32>
    %139 = arith.mulf %137, %138 : vector<16x32xf32>
    %cst_60 = arith.constant dense<0.000000e+00> : vector<16x8xf32>
    %140 = tpu.matmul %112, %134, %cst_60 {dimension_numbers = #tpu.dot_dimension_numbers<[1], [0], [0], [1], [0, 0, 1, 1], [], []>} : vector<16x32xf32>, vector<32x8xf32>, vector<16x8xf32> -> vector<16x8xf32>
    %cst_61 = arith.constant dense<0.000000e+00> : vector<16x8xf32>
    %141 = tpu.matmul %139, %135, %cst_61 {dimension_numbers = #tpu.dot_dimension_numbers<[1], [0], [0], [1], [0, 0, 1, 1], [], []>} : vector<16x32xf32>, vector<32x8xf32>, vector<16x8xf32> -> vector<16x8xf32>
    %142 = arith.addf %140, %141 : vector<16x8xf32>
    %143 = vector.broadcast %136 : vector<1x8xf32> to vector<16x8xf32>
    %144 = arith.addf %142, %143 : vector<16x8xf32>
    %145 = arith.mulf %144, %144 : vector<16x8xf32>
    %cst_62 = arith.constant dense<0.000000e+00> : vector<16xf32>
    %146 = vector.multi_reduction <add>, %145, %cst_62 [1] : vector<16x8xf32> to vector<16xf32>
    %147 = vector.shape_cast %146 : vector<16xf32> to vector<16x1xf32>
    %cst_63 = arith.constant 1.000000e-24 : f32
    %148 = vector.broadcast %cst_63 : f32 to vector<16x1xf32>
    %149 = arith.maximumf %147, %148 : vector<16x1xf32>
    %150 = math.rsqrt %149 : vector<16x1xf32>
    %151 = vector.broadcast %150 : vector<16x1xf32> to vector<16x8xf32>
    %152 = arith.mulf %144, %151 : vector<16x8xf32>
    %cst_64 = arith.constant 0.000000e+00 : f32
    %153 = vector.broadcast %cst_64 : f32 to vector<16x8xf32>
    %154 = arith.maximumf %152, %153 : vector<16x8xf32>
    %c0_65 = arith.constant 0 : index
    %c0_66 = arith.constant 0 : index
    %c0_67 = arith.constant 0 : index
    %155 = vector.load %arg3[%c0_65, %c0_66, %c0_67] : memref<1x16x8xf32, #tpu.memory_space<vmem>>, vector<1x16x8xf32>
    %156 = vector.shape_cast %155 : vector<1x16x8xf32> to vector<16x8xf32>
    %157 = arith.mulf %154, %156 : vector<16x8xf32>
    %cst_68 = arith.constant dense<0xFF800000> : vector<16xf32>
    %158 = vector.multi_reduction <maximumf>, %157, %cst_68 [1] : vector<16x8xf32> to vector<16xf32>
    %159 = vector.shape_cast %158 : vector<16xf32> to vector<16x1xf32>
    %160 = vector.broadcast %159 : vector<16x1xf32> to vector<16x8xf32>
    %161 = arith.subf %157, %160 : vector<16x8xf32>
    %162 = math.exp %161 : vector<16x8xf32>
    %cst_69 = arith.constant dense<0.000000e+00> : vector<16xf32>
    %163 = vector.multi_reduction <add>, %162, %cst_69 [1] : vector<16x8xf32> to vector<16xf32>
    %164 = vector.shape_cast %163 : vector<16xf32> to vector<16x1xf32>
    %165 = vector.broadcast %164 : vector<16x1xf32> to vector<16x8xf32>
    %166 = arith.divf %162, %165 : vector<16x8xf32>
    %167 = arith.mulf %166, %156 : vector<16x8xf32>
    %cst_70 = arith.constant dense<0.000000e+00> : vector<16xf32>
    %168 = vector.multi_reduction <add>, %167, %cst_70 [1] : vector<16x8xf32> to vector<16xf32>
    %169 = vector.shape_cast %168 : vector<16xf32> to vector<16x1xf32>
    %cst_71 = arith.constant 9.99999982E-14 : f32
    %170 = vector.broadcast %cst_71 : f32 to vector<16x1xf32>
    %171 = arith.addf %169, %170 : vector<16x1xf32>
    %172 = vector.broadcast %171 : vector<16x1xf32> to vector<16x8xf32>
    %173 = arith.divf %167, %172 : vector<16x8xf32>
    %174 = tpu.transpose %173, [1, 0] : vector<16x8xf32> -> vector<8x16xf32>
    %cst_72 = arith.constant dense<0.000000e+00> : vector<8x32xf32>
    %175 = tpu.matmul %174, %133, %cst_72 {dimension_numbers = #tpu.dot_dimension_numbers<[1], [0], [0], [1], [0, 0, 1, 1], [], []>} : vector<8x16xf32>, vector<16x32xf32>, vector<8x32xf32> -> vector<8x32xf32>
    %cst_73 = arith.constant dense<0.000000e+00> : vector<16x8xf32>
    %176 = tpu.matmul %10, %173, %cst_73 {dimension_numbers = #tpu.dot_dimension_numbers<[1], [0], [0], [1], [0, 0, 1, 1], [], []>} : vector<16x16xf32>, vector<16x8xf32>, vector<16x8xf32> -> vector<16x8xf32>
    %cst_74 = arith.constant dense<0.000000e+00> : vector<8x8xf32>
    %177 = tpu.matmul %174, %176, %cst_74 {dimension_numbers = #tpu.dot_dimension_numbers<[1], [0], [0], [1], [0, 0, 1, 1], [], []>} : vector<8x16xf32>, vector<16x8xf32>, vector<8x8xf32> -> vector<8x8xf32>
    %cst_75 = arith.constant 5.000000e-01 : f32
    %178 = vector.broadcast %cst_75 : f32 to vector<8x32xf32>
    %179 = arith.mulf %175, %178 : vector<8x32xf32>
    %c504 = arith.constant 504 : index
    %c0_76 = arith.constant 0 : index
    %180 = vector.load %arg4[%c504, %c0_76] : memref<520x128xf32, #tpu.memory_space<vmem>>, vector<8x8xf32>
    %c384 = arith.constant 384 : index
    %c0_77 = arith.constant 0 : index
    %181 = vector.load %arg4[%c384, %c0_77] : memref<520x128xf32, #tpu.memory_space<vmem>>, vector<32x32xf32>
    %c416 = arith.constant 416 : index
    %c0_78 = arith.constant 0 : index
    %182 = vector.load %arg4[%c416, %c0_78] : memref<520x128xf32, #tpu.memory_space<vmem>>, vector<1x32xf32>
    %cst_79 = arith.constant dense<0.000000e+00> : vector<8x32xf32>
    %183 = tpu.matmul %177, %179, %cst_79 {dimension_numbers = #tpu.dot_dimension_numbers<[1], [0], [0], [1], [0, 0, 1, 1], [], []>} : vector<8x8xf32>, vector<8x32xf32>, vector<8x32xf32> -> vector<8x32xf32>
    %cst_80 = arith.constant dense<0.000000e+00> : vector<8x32xf32>
    %184 = tpu.matmul %183, %181, %cst_80 {dimension_numbers = #tpu.dot_dimension_numbers<[1], [0], [0], [1], [0, 0, 1, 1], [], []>} : vector<8x32xf32>, vector<32x32xf32>, vector<8x32xf32> -> vector<8x32xf32>
    %185 = vector.broadcast %182 : vector<1x32xf32> to vector<8x32xf32>
    %186 = arith.addf %184, %185 : vector<8x32xf32>
    %187 = arith.mulf %186, %186 : vector<8x32xf32>
    %cst_81 = arith.constant dense<0.000000e+00> : vector<8xf32>
    %188 = vector.multi_reduction <add>, %187, %cst_81 [1] : vector<8x32xf32> to vector<8xf32>
    %189 = vector.shape_cast %188 : vector<8xf32> to vector<8x1xf32>
    %cst_82 = arith.constant 1.000000e-24 : f32
    %190 = vector.broadcast %cst_82 : f32 to vector<8x1xf32>
    %191 = arith.maximumf %189, %190 : vector<8x1xf32>
    %192 = math.rsqrt %191 : vector<8x1xf32>
    %193 = vector.broadcast %192 : vector<8x1xf32> to vector<8x32xf32>
    %194 = arith.mulf %186, %193 : vector<8x32xf32>
    %cst_83 = arith.constant 0.000000e+00 : f32
    %195 = vector.broadcast %cst_83 : f32 to vector<8x32xf32>
    %196 = arith.maximumf %194, %195 : vector<8x32xf32>
    %197 = arith.addf %179, %196 : vector<8x32xf32>
    %cst_84 = arith.constant dense<0.000000e+00> : vector<8xf32>
    %198 = vector.multi_reduction <add>, %197, %cst_84 [1] : vector<8x32xf32> to vector<8xf32>
    %199 = vector.shape_cast %198 : vector<8xf32> to vector<8x1xf32>
    %cst_85 = arith.constant dense<0.000000e+00> : vector<8x1xf32>
    %200 = tpu.matmul %180, %199, %cst_85 {dimension_numbers = #tpu.dot_dimension_numbers<[1], [0], [0], [1], [0, 0, 1, 1], [], []>} : vector<8x8xf32>, vector<8x1xf32>, vector<8x1xf32> -> vector<8x1xf32>
    %cst_86 = arith.constant 1.562500e-02 : f32
    %201 = vector.broadcast %cst_86 : f32 to vector<8x1xf32>
    %202 = arith.mulf %200, %201 : vector<8x1xf32>
    %203 = vector.broadcast %202 : vector<8x1xf32> to vector<8x32xf32>
    %204 = arith.subf %197, %203 : vector<8x32xf32>
    %205 = arith.mulf %204, %204 : vector<8x32xf32>
    %cst_87 = arith.constant dense<0.000000e+00> : vector<8xf32>
    %206 = vector.multi_reduction <add>, %205, %cst_87 [1] : vector<8x32xf32> to vector<8xf32>
    %207 = vector.shape_cast %206 : vector<8xf32> to vector<8x1xf32>
    %cst_88 = arith.constant dense<0.000000e+00> : vector<8x1xf32>
    %208 = tpu.matmul %180, %207, %cst_88 {dimension_numbers = #tpu.dot_dimension_numbers<[1], [0], [0], [1], [0, 0, 1, 1], [], []>} : vector<8x8xf32>, vector<8x1xf32>, vector<8x1xf32> -> vector<8x1xf32>
    %cst_89 = arith.constant 1.562500e-02 : f32
    %209 = vector.broadcast %cst_89 : f32 to vector<8x1xf32>
    %210 = arith.mulf %208, %209 : vector<8x1xf32>
    %cst_90 = arith.constant 9.99999974E-6 : f32
    %211 = vector.broadcast %cst_90 : f32 to vector<8x1xf32>
    %212 = arith.addf %210, %211 : vector<8x1xf32>
    %213 = math.rsqrt %212 : vector<8x1xf32>
    %214 = vector.broadcast %213 : vector<8x1xf32> to vector<8x32xf32>
    %215 = arith.mulf %204, %214 : vector<8x32xf32>
    %c424 = arith.constant 424 : index
    %c0_91 = arith.constant 0 : index
    %216 = vector.load %arg4[%c424, %c0_91] : memref<520x128xf32, #tpu.memory_space<vmem>>, vector<32x32xf32>
    %c456 = arith.constant 456 : index
    %c0_92 = arith.constant 0 : index
    %217 = vector.load %arg4[%c456, %c0_92] : memref<520x128xf32, #tpu.memory_space<vmem>>, vector<1x32xf32>
    %cst_93 = arith.constant dense<0.000000e+00> : vector<8x32xf32>
    %218 = tpu.matmul %177, %215, %cst_93 {dimension_numbers = #tpu.dot_dimension_numbers<[1], [0], [0], [1], [0, 0, 1, 1], [], []>} : vector<8x8xf32>, vector<8x32xf32>, vector<8x32xf32> -> vector<8x32xf32>
    %cst_94 = arith.constant dense<0.000000e+00> : vector<8x32xf32>
    %219 = tpu.matmul %218, %216, %cst_94 {dimension_numbers = #tpu.dot_dimension_numbers<[1], [0], [0], [1], [0, 0, 1, 1], [], []>} : vector<8x32xf32>, vector<32x32xf32>, vector<8x32xf32> -> vector<8x32xf32>
    %220 = vector.broadcast %217 : vector<1x32xf32> to vector<8x32xf32>
    %221 = arith.addf %219, %220 : vector<8x32xf32>
    %222 = arith.mulf %221, %221 : vector<8x32xf32>
    %cst_95 = arith.constant dense<0.000000e+00> : vector<8xf32>
    %223 = vector.multi_reduction <add>, %222, %cst_95 [1] : vector<8x32xf32> to vector<8xf32>
    %224 = vector.shape_cast %223 : vector<8xf32> to vector<8x1xf32>
    %cst_96 = arith.constant 1.000000e-24 : f32
    %225 = vector.broadcast %cst_96 : f32 to vector<8x1xf32>
    %226 = arith.maximumf %224, %225 : vector<8x1xf32>
    %227 = math.rsqrt %226 : vector<8x1xf32>
    %228 = vector.broadcast %227 : vector<8x1xf32> to vector<8x32xf32>
    %229 = arith.mulf %221, %228 : vector<8x32xf32>
    %cst_97 = arith.constant 0.000000e+00 : f32
    %230 = vector.broadcast %cst_97 : f32 to vector<8x32xf32>
    %231 = arith.maximumf %229, %230 : vector<8x32xf32>
    %232 = arith.addf %215, %231 : vector<8x32xf32>
    %cst_98 = arith.constant dense<0.000000e+00> : vector<8xf32>
    %233 = vector.multi_reduction <add>, %232, %cst_98 [1] : vector<8x32xf32> to vector<8xf32>
    %234 = vector.shape_cast %233 : vector<8xf32> to vector<8x1xf32>
    %cst_99 = arith.constant dense<0.000000e+00> : vector<8x1xf32>
    %235 = tpu.matmul %180, %234, %cst_99 {dimension_numbers = #tpu.dot_dimension_numbers<[1], [0], [0], [1], [0, 0, 1, 1], [], []>} : vector<8x8xf32>, vector<8x1xf32>, vector<8x1xf32> -> vector<8x1xf32>
    %cst_100 = arith.constant 1.562500e-02 : f32
    %236 = vector.broadcast %cst_100 : f32 to vector<8x1xf32>
    %237 = arith.mulf %235, %236 : vector<8x1xf32>
    %238 = vector.broadcast %237 : vector<8x1xf32> to vector<8x32xf32>
    %239 = arith.subf %232, %238 : vector<8x32xf32>
    %240 = arith.mulf %239, %239 : vector<8x32xf32>
    %cst_101 = arith.constant dense<0.000000e+00> : vector<8xf32>
    %241 = vector.multi_reduction <add>, %240, %cst_101 [1] : vector<8x32xf32> to vector<8xf32>
    %242 = vector.shape_cast %241 : vector<8xf32> to vector<8x1xf32>
    %cst_102 = arith.constant dense<0.000000e+00> : vector<8x1xf32>
    %243 = tpu.matmul %180, %242, %cst_102 {dimension_numbers = #tpu.dot_dimension_numbers<[1], [0], [0], [1], [0, 0, 1, 1], [], []>} : vector<8x8xf32>, vector<8x1xf32>, vector<8x1xf32> -> vector<8x1xf32>
    %cst_103 = arith.constant 1.562500e-02 : f32
    %244 = vector.broadcast %cst_103 : f32 to vector<8x1xf32>
    %245 = arith.mulf %243, %244 : vector<8x1xf32>
    %cst_104 = arith.constant 9.99999974E-6 : f32
    %246 = vector.broadcast %cst_104 : f32 to vector<8x1xf32>
    %247 = arith.addf %245, %246 : vector<8x1xf32>
    %248 = math.rsqrt %247 : vector<8x1xf32>
    %249 = vector.broadcast %248 : vector<8x1xf32> to vector<8x32xf32>
    %250 = arith.mulf %239, %249 : vector<8x32xf32>
    %c464 = arith.constant 464 : index
    %c0_105 = arith.constant 0 : index
    %251 = vector.load %arg4[%c464, %c0_105] : memref<520x128xf32, #tpu.memory_space<vmem>>, vector<32x32xf32>
    %c496 = arith.constant 496 : index
    %c0_106 = arith.constant 0 : index
    %252 = vector.load %arg4[%c496, %c0_106] : memref<520x128xf32, #tpu.memory_space<vmem>>, vector<1x32xf32>
    %cst_107 = arith.constant dense<0.000000e+00> : vector<8x32xf32>
    %253 = tpu.matmul %177, %250, %cst_107 {dimension_numbers = #tpu.dot_dimension_numbers<[1], [0], [0], [1], [0, 0, 1, 1], [], []>} : vector<8x8xf32>, vector<8x32xf32>, vector<8x32xf32> -> vector<8x32xf32>
    %cst_108 = arith.constant dense<0.000000e+00> : vector<8x32xf32>
    %254 = tpu.matmul %253, %251, %cst_108 {dimension_numbers = #tpu.dot_dimension_numbers<[1], [0], [0], [1], [0, 0, 1, 1], [], []>} : vector<8x32xf32>, vector<32x32xf32>, vector<8x32xf32> -> vector<8x32xf32>
    %255 = vector.broadcast %252 : vector<1x32xf32> to vector<8x32xf32>
    %256 = arith.addf %254, %255 : vector<8x32xf32>
    %257 = arith.mulf %256, %256 : vector<8x32xf32>
    %cst_109 = arith.constant dense<0.000000e+00> : vector<8xf32>
    %258 = vector.multi_reduction <add>, %257, %cst_109 [1] : vector<8x32xf32> to vector<8xf32>
    %259 = vector.shape_cast %258 : vector<8xf32> to vector<8x1xf32>
    %cst_110 = arith.constant 1.000000e-24 : f32
    %260 = vector.broadcast %cst_110 : f32 to vector<8x1xf32>
    %261 = arith.maximumf %259, %260 : vector<8x1xf32>
    %262 = math.rsqrt %261 : vector<8x1xf32>
    %263 = vector.broadcast %262 : vector<8x1xf32> to vector<8x32xf32>
    %264 = arith.mulf %256, %263 : vector<8x32xf32>
    %cst_111 = arith.constant 0.000000e+00 : f32
    %265 = vector.broadcast %cst_111 : f32 to vector<8x32xf32>
    %266 = arith.maximumf %264, %265 : vector<8x32xf32>
    %267 = arith.addf %250, %266 : vector<8x32xf32>
    %cst_112 = arith.constant dense<0.000000e+00> : vector<8xf32>
    %268 = vector.multi_reduction <add>, %267, %cst_112 [1] : vector<8x32xf32> to vector<8xf32>
    %269 = vector.shape_cast %268 : vector<8xf32> to vector<8x1xf32>
    %cst_113 = arith.constant dense<0.000000e+00> : vector<8x1xf32>
    %270 = tpu.matmul %180, %269, %cst_113 {dimension_numbers = #tpu.dot_dimension_numbers<[1], [0], [0], [1], [0, 0, 1, 1], [], []>} : vector<8x8xf32>, vector<8x1xf32>, vector<8x1xf32> -> vector<8x1xf32>
    %cst_114 = arith.constant 1.562500e-02 : f32
    %271 = vector.broadcast %cst_114 : f32 to vector<8x1xf32>
    %272 = arith.mulf %270, %271 : vector<8x1xf32>
    %273 = vector.broadcast %272 : vector<8x1xf32> to vector<8x32xf32>
    %274 = arith.subf %267, %273 : vector<8x32xf32>
    %275 = arith.mulf %274, %274 : vector<8x32xf32>
    %cst_115 = arith.constant dense<0.000000e+00> : vector<8xf32>
    %276 = vector.multi_reduction <add>, %275, %cst_115 [1] : vector<8x32xf32> to vector<8xf32>
    %277 = vector.shape_cast %276 : vector<8xf32> to vector<8x1xf32>
    %cst_116 = arith.constant dense<0.000000e+00> : vector<8x1xf32>
    %278 = tpu.matmul %180, %277, %cst_116 {dimension_numbers = #tpu.dot_dimension_numbers<[1], [0], [0], [1], [0, 0, 1, 1], [], []>} : vector<8x8xf32>, vector<8x1xf32>, vector<8x1xf32> -> vector<8x1xf32>
    %cst_117 = arith.constant 1.562500e-02 : f32
    %279 = vector.broadcast %cst_117 : f32 to vector<8x1xf32>
    %280 = arith.mulf %278, %279 : vector<8x1xf32>
    %cst_118 = arith.constant 9.99999974E-6 : f32
    %281 = vector.broadcast %cst_118 : f32 to vector<8x1xf32>
    %282 = arith.addf %280, %281 : vector<8x1xf32>
    %283 = math.rsqrt %282 : vector<8x1xf32>
    %284 = vector.broadcast %283 : vector<8x1xf32> to vector<8x32xf32>
    %285 = arith.mulf %274, %284 : vector<8x32xf32>
    %c512 = arith.constant 512 : index
    %c0_119 = arith.constant 0 : index
    %286 = vector.load %arg4[%c512, %c0_119] : memref<520x128xf32, #tpu.memory_space<vmem>>, vector<2x8xf32>
    %cst_120 = arith.constant dense<0.000000e+00> : vector<2x32xf32>
    %287 = tpu.matmul %286, %285, %cst_120 {dimension_numbers = #tpu.dot_dimension_numbers<[1], [0], [0], [1], [0, 0, 1, 1], [], []>} : vector<2x8xf32>, vector<8x32xf32>, vector<2x32xf32> -> vector<2x32xf32>
    %c0_121 = arith.constant 0 : index
    %c0_122 = arith.constant 0 : index
    %c0_123 = arith.constant 0 : index
    %288 = vector.load %arg5[%c0_121, %c0_122, %c0_123] : memref<1x2x32xf32, #tpu.memory_space<vmem>>, vector<1x2x32xf32>
    %289 = vector.shape_cast %288 : vector<1x2x32xf32> to vector<2x32xf32>
    %290 = vector.shape_cast %287 : vector<2x32xf32> to vector<1x2x32xf32>
    tpu.vector_store %arg5[%c0_121, %c0_122, %c0_123], %290 {strides = array<i32>} : memref<1x2x32xf32, #tpu.memory_space<vmem>>, vector<1x2x32xf32>,
    return
  }
  func.func @transform_0(%arg0: i32) -> (i32, i32, i32) {
    %c0_i32 = arith.constant 0 : i32
    %c0_i32_0 = arith.constant 0 : i32
    %c0_i32_1 = arith.constant 0 : i32
    return %arg0, %c0_i32, %c0_i32_0 : i32, i32, i32
  }
  func.func @transform_1(%arg0: i32) -> (i32, i32, i32) {
    %c0_i32 = arith.constant 0 : i32
    %c0_i32_0 = arith.constant 0 : i32
    %c0_i32_1 = arith.constant 0 : i32
    return %arg0, %c0_i32, %c0_i32_0 : i32, i32, i32
  }
  func.func @transform_2(%arg0: i32) -> (i32, i32, i32) {
    %c0_i32 = arith.constant 0 : i32
    %c0_i32_0 = arith.constant 0 : i32
    %c0_i32_1 = arith.constant 0 : i32
    return %arg0, %c0_i32, %c0_i32_0 : i32, i32, i32
  }
  func.func @transform_3(%arg0: i32) -> (i32, i32) {
    %c0_i32 = arith.constant 0 : i32
    %c0_i32_0 = arith.constant 0 : i32
    %c0_i32_1 = arith.constant 0 : i32
    return %c0_i32, %c0_i32_0 : i32, i32
  }
  func.func @transform_4(%arg0: i32) -> (i32, i32, i32) {
    %c0_i32 = arith.constant 0 : i32
    %c0_i32_0 = arith.constant 0 : i32
    %c0_i32_1 = arith.constant 0 : i32
    return %arg0, %c0_i32, %c0_i32_0 : i32, i32, i32
  }
}

</mosaic_0001>

<bundles_post_ra>
// kernel: tpu_custom_call.1
= control target key start
LH: loop header
LB: loop body
LE: loop exit
PB: predicated region body
PF: predicated region fallthrough
CT: control target
= control target key end

     0   :  { %9 = vsyncpa [#allocation3], 0  ;;  %s4315_s0 = inlined_call_operand.vmem [shape: f32[4,16,1], index: 0, kind: input, shape index: {}]   ;;  %s4316_s1 = inlined_call_operand.vmem [shape: f32[4,16,16], index: 1, kind: input, shape index: {}]   ;;  %s4317_s2 = inlined_call_operand.vmem [shape: f32[4,16,8], index: 2, kind: input, shape index: {}]   ;;  %s4318_s3 = inlined_call_operand.hbm [shape: f32[520,128], index: 3, kind: input, shape index: {}]   ;;  %s4319_s4 = inlined_call_operand.hbm [shape: f32[4,2,32], index: 4, kind: output, shape index: {}]  }
   0x1   :  { %10 = vsyncpa [#allocation4], 0 }
   0x2   :  { %12 = vsyncpa [#allocation4 + $0x1], 0  ;;  %s3974_s15 = smov 0   ;;  %s3976_s16 = smov 0  }
   0x3   :  { %s3978_s17 = smov 0   ;;  %s3980_s18 = smov 0  }
   0x4 LB: > { %s3995_s19 = sadd.s32 4294967295, %s3939_s18   ;;  %s3153_s20 = sadd.s32 4294967294, %s3939_s18   ;;  %s3939_s18 = sphi %s3980_s18, %s4335_s18   ;;  %s3935_s17 = sphi %s3978_s17, %s4334_s17   ;;  %s3931_s16 = sphi %s3976_s16, %s4333_s16   ;;  %s3927_s15 = sphi %s3974_s15, %s4332_s15  }
   0x5   : > { %s3999_s21 = sadd.s32 1, %s3939_s18   ;;  %s124_s22 = sadd.s32 1, %s3935_s17 }
   0x6   : > { %s121_s23 = ssub.s32 %s3939_s18, %s3999_s21  ;;  %p134_p0 = scmp.ne.s32.totalorder %s3935_s17, %s3931_s16 }
   0x7   : > { %p122_p1 = scmp.eq.s32.totalorder %s121_s23, 0  ;;  %p135_p2 = scmp.eq.s32.totalorder %s3995_s19, 3 }
   0x8   : > { %p140_p3 = scmp.ne.s32.totalorder %s3931_s16, %s3927_s15  ;;  %p141_p4 = scmp.eq.s32.totalorder %s3153_s20, 3 }
   0x9   : > { %s4010_s24 = scalar_select %p122_p1, %s3935_s17, %s124_s22  }
   0xa   : > { %p4012_p5 = por %p135_p2, %p134_p0  ;;  %p4016_p6 = por %p141_p4, %p140_p3 }
   0xb   : > { %p3154_p7 = scmp.ge.s32.totalorder %s3939_s18, 1  ;;  %p148_p8 = scmp.lt.s32.totalorder %s3939_s18, 5 }
   0xc   : > { %s4323_s25 = scalar_select %p4012_p5, 1, 0 }
   0xd   : > { %s4324_s26 = scalar_select %p4016_p6, 1, 0 }
   0xe   : > { %p4320_p9 = scmp.eq.s32.totalorder %s3995_s19, 0  ;;  %p4023_p10 = pnand %p3154_p7, %p148_p8 }
   0xf   : > { %s3941_s28 = smov [#allocation2]   ;;  %s3845_s7 = scalar_lea.hbm %s4318_s3, 8320 }
  0x10   : > { %s4325_s27 = scalar_select %p4023_p10, 1, 0 }
  0x11   : > { %s160_s29 = sshll.u32 %s3941_s28, 4  ;;  %p3741_p11 = pneg %p4023_p10  ;;  %s161_s29 = int_to_ptr.vmem [resolvable:$true] %s160_s29 }
  0x12   : > { %p3846_p13 = scmp.ne.s32.totalorder %s4318_s3, %s3845_s7  ;;  %p3852_p3 = scmp.lt.u32.totalorder %s3845_s7, %s4318_s3 }
  0x13   : > { %p4031_p12 = pnand %p4320_p9, %p3741_p11 }
  0x15   : > { %p3847_p0 = pneg %p4031_p12 }
  0x17   : > { %p3848_p1 = pnand %p3847_p0, %p3846_p13 }
  0x19   : > { %p3849_p2 = pneg %p3848_p1 }
  0x1b   : > { %p3854_p4 = pnand %p3852_p3, %p3849_p2 }
  0x1d   : > { %3857 = shalt.err (!%p3854_p4)
}
  0x1e   : > { %s3858_s12 = scalar_lea.vmem %s161_s29, 8320  ;;  %p3866_p9 = scmp.lt.s32.totalorder %s161_s29, %s161_s29 }
  0x1f   : > { %p3859_p7 = scmp.ne.s32.totalorder %s161_s29, %s3858_s12  ;;  %p3867_p6 = scmp.lt.s32.totalorder %s3858_s12, %s3858_s12 }
  0x21   : > { %p3861_p8 = pnand %p3859_p7, %p3847_p0  ;;  %p3868_p5 = por %p3867_p6, %p3866_p9 }
  0x23   : > { %p3862_p11 = pneg %p3861_p8 }
  0x25   : > { %p3869_p10 = pnand %p3868_p5, %p3862_p11 }
  0x27   : > { %3872 = shalt.err (!%p3869_p10)
}
  0x28   : > { %s3942_s13 = smov 128   ;;  %s3943_s14 = smov 8  }
  0x29   : > { %3744 = dma.hbm_to_vmem [thread:$0]  (!%p4031_p12), %s4318_s3, 8320, %s161_s29, [#allocation3], %s3942_s13, %s3942_s13, %s3943_s14  }
  0x2a   : > { %p4327_p13 = scmp.ne.s32.totalorder %s4325_s27, 0 }
  0x2b   : > { %p4328_p1 = scmp.eq.s32.totalorder (!%p4327_p13), %s3995_s19, 0 }
  0x2c   : > { %200 = sbr.rel (%p4327_p13) target bundleno = 8964 (0x2304), region = 36 }
  0x33   : > { %3918 = dma.done.wait (%p4328_p1), [#allocation3], 8320   ;;  %p4329_p0 = pmov %p4328_p1 }
  0x34   : > { %p236_p5 = scmp.lt.s32.totalorder %s3995_s19, 3  ;;  %v3944_v0 = vmov 0   ;;  %v271_v3 = vld [vmem:[#allocation2 + $0x10] sm:$0xff]  ;;  %v253_v4 = vld [vmem:[#allocation2] sm:$0xff]  ;;  %vm272_vm0 = vcmask 64512   ;;  %v3945_v6 = vmov 0.0  }
  0x35   : > { %3920 = vsyncadd (%p4329_p0), [#allocation3], 4294958976  ;;  %3791 = vset.pattern.permute.xlu0 %v3944_v0  ;;  %3354 = vmatprep.subr.mxu0 %v271_v3  ;;  %v254_v8 = vld [vmem:[#allocation2 + $0x8] sm:$0xff]  ;;  %vm356_vm3 = vcmask 130048   ;;  %v373_v15 = vld [vmem:[#allocation2 + $0x38] sm:$0xff]  ;;  %vm461_vm4 = vcmask 261120  }
  0x36   : > { %s237_s23 = scalar_select %p236_p5, %s3995_s19, 3  ;;  %3355 = vmatpush3.msra.mxu0 %v271_v3  ;;  %v374_v16 = vld [vmem:[#allocation2 + $0x40] sm:$0xff]  ;;  %v375_v21 = vld [vmem:[#allocation2 + $0x48] sm:$0xff]  ;;  %v376_v22 = vld [vmem:[#allocation2 + $0x50] sm:$0xff]  ;;  %vm3947_vm5 = vmmov 0   ;;  %vm3042_vm6 = vcmask 254976  }
  0x37   : > { %v3605_v17 = vpack.c.bf16 %v374_v16, %v373_v15  ;;  %v3609_v23 = vpack.c.bf16 %v376_v22, %v375_v21  ;;  %v369_v24 = vld [vmem:[#allocation2 + $0x18] sm:$0xff]  ;;  %v370_v25 = vld [vmem:[#allocation2 + $0x20] sm:$0xff]  ;;  %v371_v33 = vld [vmem:[#allocation2 + $0x28] sm:$0xff]  ;;  %s233_s11 = sand.u32 1, %s3931_s16   ;;  %s3224_s13 = sshll.u32 %s3995_s19, 5 }
  0x38   : > { %s4060_s28 = sshll.u32 %s237_s23, 4  ;;  %v3613_v26 = vpack.c.bf16 %v370_v25, %v369_v24  ;;  %v372_v34 = vld [vmem:[#allocation2 + $0x30] sm:$0xff]  ;;  %v3176_v40 = vld [vmem:[#allocation2 + $0x58] ss:$0 sm:$0xff]  ;;  %s3159_s12 = sshll.u32 %s233_s11, 1 }
  0x39   : > { %s240_s27 = scalar_lea.vmem %s4315_s0, %s4060_s28  ;;  %s245_s7 = scalar_lea.vmem %s4316_s1, %s4060_s28  ;;  %3606 = vmatprep.subr.bf16.mxu0 %v3605_v17  ;;  %v3617_v39 = vpack.c.bf16 %v372_v34, %v371_v33 }
  0x3a   : > { %v251_v1 = vld [vmem:[%s240_s27] sm:$0xff]  ;;  %v252_v2 = vld [vmem:[%s240_s27 + $0x8] sm:$0xff]  ;;  %s250_s10 = scalar_lea.vmem %s4317_s2, %s4060_s28  ;;  %s235_s14 = scalar_lea.vmem [#allocation5], %s3159_s12 }
  0x3b   : > { %257 = vperm.xlu0 %3791, %v251_v1   ;;  %v4074_v11 = vld [vmem:[%s245_s7] sm:$0xff]  ;;  %v4080_v13 = vld [vmem:[%s245_s7 + $0x8] sm:$0xff]  ;;  %s3058_s20 = sshll.u32 %s235_s14, 4  ;;  %s4273_s28 = scalar_lea.hbm %s4319_s4, %s3224_s13  ;;  %s4275_s20 = int_to_ptr.vmem [resolvable:$true] %s3058_s20 }
  0x3c   : > { %3363 = vmatprep.mubr.msk.f32.mxu1 %vm356_vm3, %v4074_v11  ;;  %v357_v12 = vsel %vm356_vm3, %v4074_v11, 0.0  ;;  %v360_v14 = vsel %vm356_vm3, %v4080_v13, 0.0  ;;  %s3045_s29 = scalar_lea.sflag [#allocation4], %s233_s11  ;;  %s3873_s30 = scalar_lea.vmem %s4275_s20, 32 }
  0x3d   : > { %358 = vadd.xlane.f32.xlu1 %v357_v12  ;;  %p3874_p6 = scmp.ne.s32.totalorder %s4275_s20, %s3873_s30  ;;  %p4330_p9 = scmp.ne.s32.totalorder %s4323_s25, 0 }
  0x3e   : > { %s3948_s19 = smov [#allocation5]  }
  0x3f   : > { %262 = vperm.xlu0 %3791, %v252_v2   ;;  %p3875_p10 = pnand %p3874_p6, %p4330_p9  ;;  %s3877_s27 = sshll.u32 %s3948_s19, 4  ;;  %s3878_s27 = int_to_ptr.vmem [resolvable:$false] %s3877_s27 }
  0x40   : > { %s3879_s5 = scalar_lea.vmem %s3878_s27, 64  ;;  %p3880_p2 = scmp.lt.s32.totalorder %s4275_s20, %s3878_s27 }
  0x41   : > { %361 = vadd.xlane.f32.xlu1 %v360_v14  ;;  %p3876_p12 = pneg %p3875_p10  ;;  %p3881_p3 = scmp.lt.s32.totalorder %s3879_s5, %s3873_s30 }
  0x43   : > { %p3882_p4 = por %p3881_p3, %p3880_p2 }
  0x45   : > { %p3883_p7 = pnand %p3882_p4, %p3876_p12 }
  0xba   : > { %v258_v5 = vpop.permute.xlu0 %257 }
  0xbb   : > { %vm265_vm1 = vcmp.eq.f32.partialorder %v253_v4, %v258_v5 }
  0xbc   : > { %v3166_v7 = vsel %vm265_vm1, 1.0, %v3945_v6 }
  0xbd   : > { %3356 = vmatprep.mubr.msk.f32.mxu0 %vm272_vm0, %v3166_v7 }
  0xbe   : > { %v263_v9 = vpop.permute.xlu0 %262 }
  0xbf   : > { %vm266_vm2 = vcmp.eq.f32.partialorder %v254_v8, %v263_v9 }
  0xc0   : > { %v3167_v10 = vsel %vm266_vm2, 1.0, %v3945_v6 }
  0xc1   : > { %3357 = vmatmul.mubr.msk.f32.vlgmr.msra.gmra.mrb[0].mxu0 %vm272_vm0, %v3167_v10 }
  0xc2   : > { %3608 = vmatpush3.bf16.msra.mxu0 %v3605_v17 }
  0xc3   : > { %3610 = vmatprep.subr.bf16.mxu0 %v3609_v23 }
  0xc6   : > { %3612 = vmatpush3.bf16.msra.mxu0 %v3609_v23 }
  0xc7   : > { %3614 = vmatprep.subr.bf16.mxu0 %v3613_v26 }
  0xca   : > { %v359_v27 = vpop.xlane.xlu1 %358 }
  0xcb   : > { %v363_v30 = vmax.f32 %v359_v27, 1.0 }
  0xce   : > { %v362_v28 = vpop.xlane.xlu1 %361 }
  0xcf   : > { %v364_v29 = vmax.f32 %v362_v28, 1.0 }
  0xd1   : > { %3793 = vrcp.f32 %v364_v29  ;;  %v681_v29 = vld [vmem:[#allocation2 + $0x80] sm:$0xff] }
  0xd2   : > { %3795 = vrcp.f32 %v363_v30  ;;  %v682_v30 = vld [vmem:[#allocation2 + $0x88] sm:$0xff] }
  0xdb   : > { %v4094_v31 = vpop.eup %3793 }
  0xdc   : > { %v4096_v35 = vpop.eup %3795 }
 0x194   : > { %v4084_v18 = vpop.f32.mrb[0].mxu0 }
 0x195   : > { %v4086_v19 = vpop.f32.mrb[1].mxu0 }
 0x196   : > { %v3601_v20 = vpack.c.bf16 %v4084_v18, %v4086_v19 }
 0x198   : > { %3602 = vmatprep.subr.bf16.mxu1 %v3601_v20 }
 0x199   : > { %3604 = vmatpush3.bf16.msra.mxu1 %v3601_v20 }
 0x19c   : > { %3364 = vmatmul.mubr.msk.f32.vlgmr.msra.gmra.mrb[0].mxu1 %vm356_vm3, %v4080_v13 }
 0x19d   : > { %3392 = vmatprep.mubr.msk.f32.mxu1 %vm356_vm3, %v4074_v11 }
 0x26f   : > { %v3365_v32 = vpop.f32.mrb[0].mxu1 }
 0x270   : > { %v450_v36 = vpop.f32.mrb[1].mxu1  ;;  %v460_v38 = vmul.f32 %v4094_v31, %v3365_v32 }
 0x271   : > { %v459_v37 = vmul.f32 %v4096_v35, %v450_v36  ;;  %v3625_v36 = vpack.c.bf16 %v682_v30, %v681_v29 }
 0x273   : > { %3374 = vmatprep.mubr.msk.f32.mxu0 %vm461_vm4, %v459_v37  ;;  %v683_v37 = vld [vmem:[#allocation2 + $0x90] sm:$0xff] }
 0x274   : > { %3375 = vmatmul.mubr.msk.f32.vlgmr.msra.gmra.mrb[2].mxu0 %vm461_vm4, %v460_v38  ;;  %v684_v38 = vld [vmem:[#allocation2 + $0x98] sm:$0xff] }
 0x275   : > { %3616 = vmatpush3.bf16.msra.mxu0 %v3613_v26  ;;  %3385 = vmatprep.mubr.msk.f32.mxu0 %vm461_vm4, %v4086_v19 }
 0x276   : > { %3618 = vmatprep.subr.bf16.mxu0 %v3617_v39 }
 0x279   : > { %3620 = vmatpush3.bf16.msra.mxu0 %v3617_v39  ;;  %v3629_v39 = vpack.c.bf16 %v684_v38, %v683_v37 }
 0x27c   : > { %3386 = vmatmul.mubr.msk.f32.vlgmr.msra.gmra.mrb[2].mxu0 %vm461_vm4, %v4084_v18 }
 0x27d   : > { %3421 = vmatprep.mubr.msk.f32.mxu0 %vm356_vm3, %v4074_v11 }
 0x34f   : > { %v3387_v41 = vpop.f32.mrb[2].mxu0 }
 0x350   : > { %v629_v42 = vadd.f32 %v3387_v41, %v3176_v40  ;;  %v615_v43 = vpop.f32.mrb[3].mxu0 }
 0x351   : > { %v628_v44 = vadd.f32 %v3176_v40, %v615_v43  ;;  %v678_v40 = vld [vmem:[#allocation2 + $0x68] sm:$0xff]  ;;  %v680_v43 = vld [vmem:[#allocation2 + $0x78] sm:$0xff] }
 0x352   : > { %v631_v45 = vmul.f32 %v629_v42, %v629_v42 }
 0x353   : > { %v630_v46 = vmul.f32 %v628_v44, %v628_v44 }
 0x354   : > { %v635_v47 = vsel %vm461_vm4, %v631_v45, 0.0 }
 0x355   : > { %636 = vadd.xlane.f32.xlu1 %v635_v47  ;;  %v632_v48 = vsel %vm461_vm4, %v630_v46, 0.0 }
 0x356   : > { %633 = vadd.xlane.f32.xlu0 %v632_v48  ;;  %v3183_v48 = vld [vmem:[#allocation2 + $0xa0] ss:$0 sm:$0xff] }
 0x3e2   : > { %v637_v49 = vpop.xlane.xlu1 %636 }
 0x3e3   : > { %v639_v50 = vmax.f32 %v637_v49, 1e-24  ;;  %v634_v51 = vpop.xlane.xlu0 %633 }
 0x3e4   : > { %v638_v52 = vmax.f32 %v634_v51, 1e-24 }
 0x3e5   : > { %3797 = vrsqrt.f32 %v639_v50 }
 0x3e6   : > { %3799 = vrsqrt.f32 %v638_v52 }
 0x3ef   : > { %v3798_v53 = vpop.eup %3797 }
 0x3f0   : > { %v3800_v54 = vpop.eup %3799  ;;  %v643_v55 = vmul.f32 %v3798_v53, %v629_v42  ;;  %v679_v42 = vld [vmem:[#allocation2 + $0x70] sm:$0xff] }
 0x3f1   : > { %v642_v56 = vmul.f32 %v3800_v54, %v628_v44  ;;  %v3637_v47 = vpack.c.bf16 %v680_v43, %v679_v42 }
 0x3f2   : > { %v645_v57 = vmax.f32 %v643_v55, 0.0 }
 0x3f3   : > { %v644_v58 = vmax.f32 %v642_v56, 0.0 }
 0x3f4   : > { %v647_v59 = vsel %vm461_vm4, %v645_v57, 0.0 }
 0x3f5   : > { %v646_v60 = vsel %vm461_vm4, %v644_v58, 0.0 }
 0x3f6   : > { %v648_v61 = vadd.f32 %v647_v59, %v646_v60 }
 0x3f8   : > { %v649_v62 = vrot.slane %v648_v61, 4 }
 0x3fa   : > { %v650_v63 = vadd.f32 %v649_v62, %v648_v61 }
 0x3fc   : > { %v651_v1 = vrot.slane %v650_v63, 2 }
 0x3fe   : > { %v652_v2 = vadd.f32 %v651_v1, %v650_v63 }
 0x400   : > { %v653_v3 = vrot.slane %v652_v2, 1 }
 0x402   : > { %v654_v4 = vadd.f32 %v653_v3, %v652_v2 }
 0x404   : > { %v656_v5 = vmul.f32 0.0625, %v654_v4 }
 0x406   : > { %v657_v7 = vsub.f32 %v644_v58, %v656_v5  ;;  %v658_v8 = vsub.f32 %v645_v57, %v656_v5 }
 0x408   : > { %v659_v9 = vmul.f32 %v657_v7, %v657_v7  ;;  %v660_v10 = vmul.f32 %v658_v8, %v658_v8 }
 0x40a   : > { %v661_v12 = vsel %vm461_vm4, %v659_v9, 0.0  ;;  %v662_v14 = vsel %vm461_vm4, %v660_v10, 0.0 }
 0x40b   : > { %v663_v15 = vadd.f32 %v662_v14, %v661_v12 }
 0x40d   : > { %v664_v16 = vrot.slane %v663_v15, 4 }
 0x40f   : > { %v665_v17 = vadd.f32 %v664_v16, %v663_v15 }
 0x411   : > { %v666_v20 = vrot.slane %v665_v17, 2 }
 0x413   : > { %v667_v21 = vadd.f32 %v666_v20, %v665_v17 }
 0x415   : > { %v668_v22 = vrot.slane %v667_v21, 1 }
 0x417   : > { %v669_v23 = vadd.f32 %v668_v22, %v667_v21 }
 0x419   : > { %v670_v24 = vmul.f32 0.0625, %v669_v23 }
 0x41b   : > { %v671_v25 = vadd.f32 1e-05, %v670_v24 }
 0x41d   : > { %3801 = vrsqrt.f32 %v671_v25 }
 0x427   : > { %v3802_v26 = vpop.eup %3801 }
 0x428   : > { %v673_v27 = vmul.f32 %v3802_v26, %v657_v7  ;;  %v674_v28 = vmul.f32 %v3802_v26, %v658_v8 }
 0x42a   : > { %v4115_v32 = vadd.f32 %v673_v27, %v4086_v19  ;;  %v4118_v33 = vadd.f32 %v4084_v18, %v674_v28  ;;  %v677_v19 = vld [vmem:[#allocation2 + $0x60] sm:$0xff] }
 0x42b   : > { %v3633_v18 = vpack.c.bf16 %v678_v40, %v677_v19  ;;  %v981_v40 = vld [vmem:[#allocation2 + $0xc8] sm:$0xff] }
 0x42c   : > { %v3621_v34 = vpack.c.bf16 %v4118_v33, %v4115_v32 }
 0x42e   : > { %3622 = vmatprep.subr.bf16.mxu1 %v3621_v34 }
 0x42f   : > { %3624 = vmatpush3.bf16.msra.mxu1 %v3621_v34 }
 0x430   : > { %3626 = vmatprep.subr.bf16.mxu1 %v3625_v36 }
 0x432   : > { %3393 = vmatmul.mubr.msk.f32.vlgmr.msra.gmra.mrb[2].mxu1 %vm356_vm3, %v4080_v13 }
 0x433   : > { %3628 = vmatpush3.bf16.msra.mxu1 %v3625_v36 }
 0x434   : > { %3630 = vmatprep.subr.bf16.mxu1 %v3629_v39 }
 0x437   : > { %3632 = vmatpush3.bf16.msra.mxu1 %v3629_v39 }
 0x438   : > { %3634 = vmatprep.subr.bf16.mxu1 %v3633_v18 }
 0x505   : > { %v3394_v41 = vpop.f32.mrb[2].mxu1 }
 0x506   : > { %v752_v44 = vpop.f32.mrb[3].mxu1  ;;  %v762_v46 = vmul.f32 %v4094_v31, %v3394_v41 }
 0x507   : > { %v761_v45 = vmul.f32 %v4096_v35, %v752_v44 }
 0x509   : > { %3403 = vmatprep.mubr.msk.f32.mxu1 %vm461_vm4, %v761_v45  ;;  %v983_v45 = vld [vmem:[#allocation2 + $0xd8] sm:$0xff] }
 0x50a   : > { %3404 = vmatmul.mubr.msk.f32.vlgmr.msra.gmra.mrb[4].mxu1 %vm461_vm4, %v762_v46  ;;  %v984_v46 = vld [vmem:[#allocation2 + $0xe0] sm:$0xff] }
 0x50b   : > { %3636 = vmatpush3.bf16.msra.mxu1 %v3633_v18  ;;  %3414 = vmatprep.mubr.msk.f32.mxu1 %vm461_vm4, %v4115_v32  ;;  %v982_v18 = vld [vmem:[#allocation2 + $0xd0] sm:$0xff] }
 0x50c   : > { %3638 = vmatprep.subr.bf16.mxu1 %v3637_v47  ;;  %v3645_v44 = vpack.c.bf16 %v982_v18, %v981_v40  ;;  %v1249_v40 = vld [vmem:[#allocation2 + $0x100] sm:$0xff] }
 0x50f   : > { %3640 = vmatpush3.bf16.msra.mxu1 %v3637_v47  ;;  %v3649_v47 = vpack.c.bf16 %v984_v46, %v983_v45 }
 0x512   : > { %3415 = vmatmul.mubr.msk.f32.vlgmr.msra.gmra.mrb[4].mxu1 %vm461_vm4, %v4118_v33 }
 0x513   : > { %3450 = vmatprep.mubr.msk.f32.mxu1 %vm356_vm3, %v4074_v11 }
 0x5e5   : > { %v3416_v49 = vpop.f32.mrb[4].mxu1 }
 0x5e6   : > { %v916_v50 = vpop.f32.mrb[5].mxu1  ;;  %v930_v51 = vadd.f32 %v3416_v49, %v3183_v48  ;;  %v978_v49 = vld [vmem:[#allocation2 + $0xb0] sm:$0xff] }
 0x5e7   : > { %v929_v52 = vadd.f32 %v3183_v48, %v916_v50  ;;  %v977_v48 = vld [vmem:[#allocation2 + $0xa8] sm:$0xff] }
 0x5e8   : > { %v932_v55 = vmul.f32 %v930_v51, %v930_v51  ;;  %v3653_v50 = vpack.c.bf16 %v978_v49, %v977_v48 }
 0x5e9   : > { %v931_v53 = vmul.f32 %v929_v52, %v929_v52 }
 0x5ea   : > { %v936_v56 = vsel %vm461_vm4, %v932_v55, 0.0 }
 0x5eb   : > { %v933_v54 = vsel %vm461_vm4, %v931_v53, 0.0 }
 0x5ec   : > { %934 = vadd.xlane.f32.xlu1 %v933_v54 }
 0x5f0   : > { %937 = vadd.xlane.f32.xlu1 %v936_v56  ;;  %v3190_v56 = vld [vmem:[#allocation2 + $0xe8] ss:$0 sm:$0xff] }
 0x679   : > { %v935_v57 = vpop.xlane.xlu1 %934 }
 0x67a   : > { %v939_v58 = vmax.f32 %v935_v57, 1e-24 }
 0x67c   : > { %3803 = vrsqrt.f32 %v939_v58 }
 0x67d   : > { %v938_v59 = vpop.xlane.xlu1 %937 }
 0x67e   : > { %v940_v60 = vmax.f32 %v938_v59, 1e-24 }
 0x680   : > { %3805 = vrsqrt.f32 %v940_v60 }
 0x686   : > { %v3804_v61 = vpop.eup %3803 }
 0x687   : > { %v943_v62 = vmul.f32 %v3804_v61, %v929_v52 }
 0x689   : > { %v945_v1 = vmax.f32 %v943_v62, 0.0 }
 0x68a   : > { %v3806_v63 = vpop.eup %3805 }
 0x68b   : > { %v944_v2 = vmul.f32 %v3806_v63, %v930_v51  ;;  %v947_v4 = vsel %vm461_vm4, %v945_v1, 0.0  ;;  %v980_v51 = vld [vmem:[#allocation2 + $0xc0] sm:$0xff] }
 0x68d   : > { %v946_v3 = vmax.f32 %v944_v2, 0.0  ;;  %v1521_v2 = vld [vmem:[#allocation2 + $0x158] sm:$0xff] }
 0x68f   : > { %v948_v5 = vsel %vm461_vm4, %v946_v3, 0.0 }
 0x690   : > { %v949_v7 = vadd.f32 %v948_v5, %v947_v4 }
 0x692   : > { %v950_v8 = vrot.slane %v949_v7, 4 }
 0x694   : > { %v951_v9 = vadd.f32 %v950_v8, %v949_v7 }
 0x696   : > { %v952_v10 = vrot.slane %v951_v9, 2 }
 0x698   : > { %v953_v12 = vadd.f32 %v952_v10, %v951_v9 }
 0x69a   : > { %v954_v14 = vrot.slane %v953_v12, 1 }
 0x69c   : > { %v955_v15 = vadd.f32 %v954_v14, %v953_v12 }
 0x69e   : > { %v956_v16 = vmul.f32 0.0625, %v955_v15 }
 0x6a0   : > { %v957_v17 = vsub.f32 %v945_v1, %v956_v16  ;;  %v958_v20 = vsub.f32 %v946_v3, %v956_v16  ;;  %v1522_v3 = vld [vmem:[#allocation2 + $0x160] sm:$0xff]  ;;  %v1251_v16 = vld [vmem:[#allocation2 + $0x110] sm:$0xff] }
 0x6a1   : > { %v3681_v4 = vpack.c.bf16 %v1522_v3, %v1521_v2  ;;  %v1699_v3 = vld [vmem:[%s250_s10 + $0x8] sm:$0xff] }
 0x6a2   : > { %v959_v21 = vmul.f32 %v957_v17, %v957_v17  ;;  %v960_v22 = vmul.f32 %v958_v20, %v958_v20 }
 0x6a4   : > { %v961_v23 = vsel %vm461_vm4, %v959_v21, 0.0  ;;  %v962_v24 = vsel %vm461_vm4, %v960_v22, 0.0 }
 0x6a5   : > { %v963_v25 = vadd.f32 %v962_v24, %v961_v23  ;;  %v1253_v24 = vld [vmem:[#allocation2 + $0x120] sm:$0xff] }
 0x6a7   : > { %v964_v26 = vrot.slane %v963_v25, 4 }
 0x6a9   : > { %v965_v27 = vadd.f32 %v964_v26, %v963_v25  ;;  %v1254_v25 = vld [vmem:[#allocation2 + $0x128] sm:$0xff] }
 0x6aa   : > { %v1523_v26 = vld [vmem:[#allocation2 + $0x168] sm:$0xff] }
 0x6ab   : > { %v966_v28 = vrot.slane %v965_v27, 2 }
 0x6ad   : > { %v967_v29 = vadd.f32 %v966_v28, %v965_v27  ;;  %v3669_v27 = vpack.c.bf16 %v1254_v25, %v1253_v24  ;;  %v1524_v28 = vld [vmem:[#allocation2 + $0x170] sm:$0xff] }
 0x6ae   : > { %v3197_v25 = vld [vmem:[#allocation2 + $0x130] ss:$0 sm:$0xff] }
 0x6af   : > { %v968_v30 = vrot.slane %v967_v29, 1 }
 0x6b1   : > { %v969_v34 = vadd.f32 %v968_v30, %v967_v29  ;;  %v3685_v29 = vpack.c.bf16 %v1524_v28, %v1523_v26  ;;  %v1247_v30 = vld [vmem:[#allocation2 + $0xf0] sm:$0xff] }
 0x6b3   : > { %v970_v36 = vmul.f32 0.0625, %v969_v34  ;;  %v1248_v34 = vld [vmem:[#allocation2 + $0xf8] sm:$0xff] }
 0x6b5   : > { %v971_v37 = vadd.f32 1e-05, %v970_v36  ;;  %v1517_v36 = vld [vmem:[#allocation2 + $0x138] sm:$0xff] }
 0x6b7   : > { %3807 = vrsqrt.f32 %v971_v37  ;;  %v3673_v37 = vpack.c.bf16 %v1248_v34, %v1247_v30 }
 0x6c1   : > { %v3808_v38 = vpop.eup %3807 }
 0x6c2   : > { %v973_v39 = vmul.f32 %v3808_v38, %v957_v17  ;;  %v974_v19 = vmul.f32 %v3808_v38, %v958_v20  ;;  %v1252_v17 = vld [vmem:[#allocation2 + $0x118] sm:$0xff]  ;;  %v1518_v38 = vld [vmem:[#allocation2 + $0x140] sm:$0xff] }
 0x6c3   : > { %v3665_v23 = vpack.c.bf16 %v1252_v17, %v1251_v16 }
 0x6c4   : > { %v975_v41 = vadd.f32 %v973_v39, %v4115_v32  ;;  %v976_v42 = vadd.f32 %v974_v19, %v4118_v33  ;;  %v979_v33 = vld [vmem:[#allocation2 + $0xb8] sm:$0xff]  ;;  %v3689_v39 = vpack.c.bf16 %v1518_v38, %v1517_v36 }
 0x6c5   : > { %v3657_v55 = vpack.c.bf16 %v980_v51, %v979_v33 }
 0x6c6   : > { %v3641_v43 = vpack.c.bf16 %v976_v42, %v975_v41 }
 0x6c8   : > { %3642 = vmatprep.subr.bf16.mxu0 %v3641_v43 }
 0x6c9   : > { %3644 = vmatpush3.bf16.msra.mxu0 %v3641_v43  ;;  %v1520_v43 = vld [vmem:[#allocation2 + $0x150] sm:$0xff] }
 0x6ca   : > { %3646 = vmatprep.subr.bf16.mxu0 %v3645_v44 }
 0x6cc   : > { %3422 = vmatmul.mubr.msk.f32.vlgmr.msra.gmra.mrb[4].mxu0 %vm356_vm3, %v4080_v13 }
 0x6cd   : > { %3648 = vmatpush3.bf16.msra.mxu0 %v3645_v44 }
 0x6ce   : > { %3650 = vmatprep.subr.bf16.mxu0 %v3649_v47 }
 0x6d1   : > { %3652 = vmatpush3.bf16.msra.mxu0 %v3649_v47 }
 0x6d2   : > { %3654 = vmatprep.subr.bf16.mxu0 %v3653_v50 }
 0x79f   : > { %v3423_v32 = vpop.f32.mrb[4].mxu0 }
 0x7a0   : > { %v1052_v52 = vpop.f32.mrb[5].mxu0  ;;  %v1062_v54 = vmul.f32 %v4094_v31, %v3423_v32 }
 0x7a1   : > { %v1061_v53 = vmul.f32 %v4096_v35, %v1052_v52 }
 0x7a3   : > { %3432 = vmatprep.mubr.msk.f32.mxu0 %vm461_vm4, %v1061_v53 }
 0x7a4   : > { %3433 = vmatmul.mubr.msk.f32.vlgmr.msra.gmra.mrb[6].mxu0 %vm461_vm4, %v1062_v54 }
 0x7a5   : > { %3656 = vmatpush3.bf16.msra.mxu0 %v3653_v50  ;;  %3443 = vmatprep.mubr.msk.f32.mxu0 %vm461_vm4, %v975_v41 }
 0x7a6   : > { %3658 = vmatprep.subr.bf16.mxu0 %v3657_v55 }
 0x7a9   : > { %3660 = vmatpush3.bf16.msra.mxu0 %v3657_v55 }
 0x7aa   : > { %3682 = vmatprep.subr.bf16.mxu0 %v3681_v4 }
 0x7ac   : > { %3444 = vmatmul.mubr.msk.f32.vlgmr.msra.gmra.mrb[6].mxu0 %vm461_vm4, %v976_v42 }
 0x7ad   : > { %3684 = vmatpush3.bf16.msra.mxu0 %v3681_v4 }
 0x7ae   : > { %3686 = vmatprep.subr.bf16.mxu0 %v3685_v29 }
 0x7b1   : > { %3688 = vmatpush3.bf16.msra.mxu0 %v3685_v29 }
 0x7b2   : > { %3690 = vmatprep.subr.bf16.mxu0 %v3689_v39 }
 0x87f   : > { %v3445_v57 = vpop.f32.mrb[6].mxu0 }
 0x880   : > { %v1216_v58 = vpop.f32.mrb[7].mxu0  ;;  %v1230_v59 = vadd.f32 %v3445_v57, %v3190_v56 }
 0x881   : > { %v1229_v60 = vadd.f32 %v3190_v56, %v1216_v58 }
 0x882   : > { %v1232_v63 = vmul.f32 %v1230_v59, %v1230_v59 }
 0x883   : > { %v1231_v61 = vmul.f32 %v1229_v60, %v1229_v60 }
 0x884   : > { %v1236_v1 = vsel %vm461_vm4, %v1232_v63, 0.0 }
 0x885   : > { %v1233_v62 = vsel %vm461_vm4, %v1231_v61, 0.0  ;;  %v1698_v61 = vld [vmem:[%s250_s10] sm:$0xff] }
 0x886   : > { %1234 = vadd.xlane.f32.xlu1 %v1233_v62 }
 0x88a   : > { %1237 = vadd.xlane.f32.xlu1 %v1236_v1 }
 0x913   : > { %v1235_v5 = vpop.xlane.xlu1 %1234 }
 0x914   : > { %v1239_v7 = vmax.f32 %v1235_v5, 1e-24 }
 0x916   : > { %3809 = vrsqrt.f32 %v1239_v7 }
 0x917   : > { %v1238_v8 = vpop.xlane.xlu1 %1237 }
 0x918   : > { %v1240_v9 = vmax.f32 %v1238_v8, 1e-24 }
 0x91a   : > { %3811 = vrsqrt.f32 %v1240_v9 }
 0x920   : > { %v3810_v10 = vpop.eup %3809 }
 0x921   : > { %v1243_v12 = vmul.f32 %v3810_v10, %v1229_v60 }
 0x923   : > { %v1245_v20 = vadd.f32 %v1243_v12, %v975_v41  ;;  %v1250_v41 = vld [vmem:[#allocation2 + $0x108] sm:$0xff] }
 0x924   : > { %v3812_v14 = vpop.eup %3811  ;;  %v3677_v46 = vpack.c.bf16 %v1250_v41, %v1249_v40 }
 0x925   : > { %v1244_v15 = vmul.f32 %v3812_v14, %v1230_v59 }
 0x927   : > { %v1246_v21 = vadd.f32 %v1244_v15, %v976_v42  ;;  %v1519_v42 = vld [vmem:[#allocation2 + $0x148] sm:$0xff] }
 0x928   : > { %v3693_v47 = vpack.c.bf16 %v1520_v43, %v1519_v42  ;;  %v3946_v42 = vmov 0.0|0.0  }
 0x929   : > { %v3661_v22 = vpack.c.bf16 %v1246_v21, %v1245_v20 }
 0x92b   : > { %3662 = vmatprep.subr.bf16.mxu1 %v3661_v22 }
 0x92c   : > { %3664 = vmatpush3.bf16.msra.mxu1 %v3661_v22 }
 0x92d   : > { %3666 = vmatprep.subr.bf16.mxu1 %v3665_v23 }
 0x92f   : > { %3451 = vmatmul.mubr.msk.f32.vlgmr.msra.gmra.mrb[6].mxu1 %vm356_vm3, %v4080_v13 }
 0x930   : > { %3668 = vmatpush3.bf16.msra.mxu1 %v3665_v23 }
 0x931   : > { %3670 = vmatprep.subr.bf16.mxu1 %v3669_v27 }
 0x934   : > { %3672 = vmatpush3.bf16.msra.mxu1 %v3669_v27 }
 0x935   : > { %3674 = vmatprep.subr.bf16.mxu1 %v3673_v37 }
 0xa02   : > { %v3452_v19 = vpop.f32.mrb[6].mxu1 }
 0xa03   : > { %v1322_v18 = vpop.f32.mrb[7].mxu1  ;;  %v1332_v45 = vmul.f32 %v4094_v31, %v3452_v19 }
 0xa04   : > { %v1331_v44 = vmul.f32 %v4096_v35, %v1322_v18  ;;  %v3202_v35 = vld [vmem:[#allocation2 + $0x178] ss:$0 sm:$0xff] }
 0xa06   : > { %3461 = vmatprep.mubr.msk.f32.mxu1 %vm461_vm4, %v1331_v44  ;;  %3483 = vmatprep.mubr.msk.f32.mxu0 %vm461_vm4, %v1331_v44 }
 0xa07   : > { %3462 = vmatmul.mubr.msk.f32.vlgmr.msra.gmra.mrb[8].mxu1 %vm461_vm4, %v1332_v45  ;;  %3484 = vmatmul.mubr.msk.f32.vlgmr.msra.gmra.mrb[8].mxu0 %vm461_vm4, %v1332_v45 }
 0xa08   : > { %3676 = vmatpush3.bf16.msra.mxu1 %v3673_v37  ;;  %3472 = vmatprep.mubr.msk.f32.mxu1 %vm461_vm4, %v1245_v20 }
 0xa09   : > { %3692 = vmatpush3.bf16.msra.mxu0 %v3689_v39  ;;  %3494 = vmatprep.mubr.msk.f32.mxu0 %vm461_vm4, %v1245_v20 }
 0xa0a   : > { %3678 = vmatprep.subr.bf16.mxu1 %v3677_v46  ;;  %3694 = vmatprep.subr.bf16.mxu0 %v3693_v47 }
 0xa0c   : > { %3680 = vmatpush3.bf16.msra.mxu1 %v3677_v46 }
 0xa0d   : > { %3696 = vmatpush3.bf16.msra.mxu0 %v3693_v47  ;;  %3697 = vmatprep.subr.bf16.mxu1 %v3946_v42 }
 0xa0e   : > { %3518 = vmatprep.subr.mxu0 %v3945_v6 }
 0xa0f   : > { %3473 = vmatmul.mubr.msk.f32.vlgmr.msra.gmra.mrb[8].mxu1 %vm461_vm4, %v1246_v21 }
 0xa10   : > { %3495 = vmatmul.mubr.msk.f32.vlgmr.msra.gmra.mrb[8].mxu0 %vm461_vm4, %v1246_v21  ;;  %3501 = vmatprep.mubr.msk.f32.mxu1 %vm3947_vm5, %v3945_v6 }
 0xa11   : > { %3520 = vmatprep.mubr.msk.f32.mxu0 %vm3947_vm5, %v3945_v6 }
 0xae2   : > { %v3474_v31 = vpop.f32.mrb[8].mxu1 }
 0xae3   : > { %v3496_v48 = vpop.f32.mrb[8].mxu0  ;;  %v1486_v49 = vpop.f32.mrb[9].mxu1  ;;  %v1500_v34 = vadd.f32 %v3474_v31, %v3197_v25 }
 0xae4   : > { %v1667_v50 = vpop.f32.mrb[9].mxu0  ;;  %v1681_v32 = vadd.f32 %v3496_v48, %v3202_v35  ;;  %v1499_v27 = vadd.f32 %v3197_v25, %v1486_v49 }
 0xae5   : > { %v1680_v33 = vadd.f32 %v3202_v35, %v1667_v50  ;;  %v1502_v18 = vmul.f32 %v1500_v34, %v1500_v34 }
 0xae6   : > { %v1683_v53 = vmul.f32 %v1681_v32, %v1681_v32  ;;  %v1501_v38 = vmul.f32 %v1499_v27, %v1499_v27 }
 0xae7   : > { %v1682_v51 = vmul.f32 %v1680_v33, %v1680_v33  ;;  %v1506_v41 = vsel %vm461_vm4, %v1502_v18, 0.0 }
 0xae8   : > { %v1687_v54 = vsel %vm272_vm0, %v1683_v53, 0.0  ;;  %v1503_v40 = vsel %vm461_vm4, %v1501_v38, 0.0 }
 0xae9   : > { %v1684_v52 = vsel %vm272_vm0, %v1682_v51, 0.0 }
 0xaea   : > { %1685 = vadd.xlane.f32.xlu1 %v1684_v52 }
 0xaee   : > { %1688 = vadd.xlane.f32.xlu1 %v1687_v54 }
 0xb77   : > { %v1686_v55 = vpop.xlane.xlu1 %1685 }
 0xb78   : > { %v1690_v56 = vmax.f32 %v1686_v55, 1e-24 }
 0xb7a   : > { %3813 = vrsqrt.f32 %v1690_v56 }
 0xb7b   : > { %v1689_v57 = vpop.xlane.xlu1 %1688 }
 0xb7c   : > { %v1691_v58 = vmax.f32 %v1689_v57, 1e-24 }
 0xb7e   : > { %3815 = vrsqrt.f32 %v1691_v58 }
 0xb84   : > { %v3814_v59 = vpop.eup %3813 }
 0xb85   : > { %v1694_v60 = vmul.f32 %v3814_v59, %v1680_v33 }
 0xb87   : > { %v1696_v62 = vmax.f32 %v1694_v60, 0.0 }
 0xb88   : > { %v3816_v63 = vpop.eup %3815 }
 0xb89   : > { %v1700_v1 = vmul.f32 %v1698_v61, %v1696_v62  ;;  %v1695_v2 = vmul.f32 %v3816_v63, %v1681_v32 }
 0xb8b   : > { %v1702_v4 = vsel %vm272_vm0, %v1700_v1, -inf  ;;  %v1697_v5 = vmax.f32 %v1695_v2, 0.0  ;;  %v1992_v2 = vld [vmem:[#allocation2 + $0x190] sm:$0xff] }
 0xb8c   : > { %1703 = vmax.xlane.f32.xlu1 %v1702_v4  ;;  %v1993_v4 = vld [vmem:[#allocation2 + $0x198] sm:$0xff] }
 0xb8d   : > { %v1701_v7 = vmul.f32 %v1699_v3, %v1697_v5  ;;  %v3711_v5 = vpack.c.bf16 %v1993_v4, %v1992_v2 }
 0xb8f   : > { %v1705_v8 = vsel %vm272_vm0, %v1701_v7, -inf }
 0xb90   : > { %1706 = vmax.xlane.f32.xlu0 %v1705_v8 }
 0xc19   : > { %v1704_v9 = vpop.xlane.xlu1 %1703 }
 0xc1a   : > { %v1708_v10 = vsub.f32 %v1700_v1, %v1704_v9 }
 0xc1c   : > { %v1710_v12 = vmul.f32 1.442695, %v1708_v10 }
 0xc1d   : > { %v1707_v14 = vpop.xlane.xlu0 %1706 }
 0xc1e   : > { %3817 = vpow2.f32 %v1710_v12  ;;  %v1709_v15 = vsub.f32 %v1701_v7, %v1707_v14  ;;  %v3208_v12 = vld [vmem:[#allocation2 + $0x1a0] ss:$0 sm:$0xff] }
 0xc20   : > { %v1712_v16 = vmul.f32 1.442695, %v1709_v15 }
 0xc22   : > { %3819 = vpow2.f32 %v1712_v16 }
 0xc28   : > { %v3818_v17 = vpop.eup %3817 }
 0xc29   : > { %v1714_v20 = vsel %vm272_vm0, %v3818_v17, 0.0 }
 0xc2a   : > { %1715 = vadd.xlane.f32.xlu1 %v1714_v20 }
 0xc2c   : > { %v3820_v21 = vpop.eup %3819 }
 0xc2d   : > { %v1717_v22 = vsel %vm272_vm0, %v3820_v21, 0.0 }
 0xc2e   : > { %1718 = vadd.xlane.f32.xlu0 %v1717_v22 }
 0xcb7   : > { %v1716_v23 = vpop.xlane.xlu1 %1715 }
 0xcb8   : > { %3821 = vrcp.f32 %v1716_v23 }
 0xcbb   : > { %v1719_v24 = vpop.xlane.xlu0 %1718 }
 0xcbc   : > { %3823 = vrcp.f32 %v1719_v24 }
 0xcc2   : > { %v3822_v26 = vpop.eup %3821 }
 0xcc3   : > { %v1721_v28 = vmul.f32 %v3822_v26, %v3818_v17 }
 0xcc5   : > { %v1724_v29 = vmul.f32 %v1721_v28, %v1698_v61  ;;  %v4211_v28 = vld [vmem:[#allocation2 + $0x1f8] sm:$0xff] }
 0xcc6   : > { %v3824_v30 = vpop.eup %3823 }
 0xcc7   : > { %v1726_v36 = vsel %vm272_vm0, %v1724_v29, 0.0  ;;  %v1723_v37 = vmul.f32 %v3824_v30, %v3820_v21 }
 0xcc8   : > { %1727 = vadd.xlane.f32.xlu1 %v1726_v36 }
 0xcc9   : > { %v1725_v39 = vmul.f32 %v1723_v37, %v1699_v3 }
 0xccb   : > { %v1729_v19 = vsel %vm272_vm0, %v1725_v39, 0.0 }
 0xccc   : > { %1730 = vadd.xlane.f32.xlu0 %v1729_v19  ;;  %1504 = vadd.xlane.f32.xlu1 %v1503_v40 }
 0xcd0   : > { %1507 = vadd.xlane.f32.xlu0 %v1506_v41 }
 0xd55   : > { %v1728_v43 = vpop.xlane.xlu1 %1727 }
 0xd56   : > { %v1732_v44 = vadd.f32 1e-13, %v1728_v43 }
 0xd58   : > { %3825 = vrcp.f32 %v1732_v44 }
 0xd59   : > { %v1731_v45 = vpop.xlane.xlu0 %1730  ;;  %v1505_v46 = vpop.xlane.xlu1 %1504 }
 0xd5a   : > { %v1733_v47 = vadd.f32 1e-13, %v1731_v45  ;;  %v1509_v31 = vmax.f32 %v1505_v46, 1e-24  ;;  %v2320_v46 = vld [vmem:[#allocation2 + $0x1a8] sm:$0xff] }
 0xd5c   : > { %3827 = vrcp.f32 %v1733_v47  ;;  %v2321_v47 = vld [vmem:[#allocation2 + $0x1b0] sm:$0xff] }
 0xd5d   : > { %3829 = vrsqrt.f32 %v1509_v31  ;;  %v1508_v35 = vpop.xlane.xlu0 %1507  ;;  %v2322_v31 = vld [vmem:[#allocation2 + $0x1b8] sm:$0xff] }
 0xd5e   : > { %v1510_v48 = vmax.f32 %v1508_v35, 1e-24  ;;  %v3714_v35 = vpack.c.bf16 %v2321_v47, %v2320_v46 }
 0xd60   : > { %3831 = vrsqrt.f32 %v1510_v48  ;;  %v2323_v48 = vld [vmem:[#allocation2 + $0x1c0] sm:$0xff] }
 0xd62   : > { %v3826_v49 = vpop.eup %3825 }
 0xd63   : > { %v1735_v50 = vmul.f32 %v3826_v49, %v1724_v29  ;;  %v3717_v49 = vpack.c.bf16 %v2323_v48, %v2322_v31 }
 0xd65   : > { %1738 = vxpose.xlu1.b32.start [1/2] (short) (narrow) %v1735_v50, 8 }
 0xd66   : > { %v3828_v32 = vpop.eup %3827 }
 0xd67   : > { %v3830_v33 = vpop.eup %3829  ;;  %v1737_v51 = vmul.f32 %v3828_v32, %v1725_v39 }
 0xd68   : > { %v1513_v52 = vmul.f32 %v3830_v33, %v1499_v27 }
 0xd69   : > { %1739 = vxpose.xlu1.b32.end [2/2] (short) (narrow) %v1737_v51, 8  ;;  %v3700_v58 = vpack.c.bf16 %v1737_v51, %v1735_v50 }
 0xd6a   : > { %v3832_v53 = vpop.eup %3831  ;;  %v1515_v55 = vmax.f32 %v1513_v52, 0.0  ;;  %v3213_v52 = vld [vmem:[#allocation2 + $0x1c8] ss:$0 sm:$0xff] }
 0xd6b   : > { %v1514_v54 = vmul.f32 %v3832_v53, %v1500_v34 }
 0xd6d   : > { %v1516_v56 = vmax.f32 %v1514_v54, 0.0 }
 0xd6f   : > { %v3698_v57 = vpack.c.bf16 %v1516_v56, %v1515_v55 }
 0xd71   : > { %3699 = vmatpush3.bf16.msra.mxu1 %v3698_v57 }
 0xd72   : > { %3701 = vmatprep.subr.bf16.mxu1 %v3700_v58 }
 0xd87   : > { %3792 = vset.pattern.permute.xlu1 %v3944_v0 }
 0xde5   : > { %v1754_v59 = vpop.trf.xlu1 }
 0xde6   : > { %3502 = vmatmul.mubr.msk.f32.vlgmr.msra.gmra.mrb[10].mxu1 %vm356_vm3, %v1754_v59 }
 0xde7   : > { %3703 = vmatpush3.bf16.msra.mxu1 %v3700_v58  ;;  %3508 = vmatprep.mubr.msk.f32.mxu1 %vm356_vm3, %v4074_v11  ;;  %v1990_v11 = vld [vmem:[#allocation2 + $0x180] sm:$0xff] }
 0xde8   : > { %3704 = vmatprep.subr.bf16.mxu1 %v3946_v42 }
 0xdea   : > { %3509 = vmatmul.mubr.msk.f32.vlgmr.msra.gmra.mrb[12].mxu1 %vm356_vm3, %v4080_v13  ;;  %v1991_v13 = vld [vmem:[#allocation2 + $0x188] sm:$0xff] }
 0xdeb   : > { %3515 = vmatprep.mubr.msk.f32.mxu1 %vm3947_vm5, %v3945_v6  ;;  %v3708_v3 = vpack.c.bf16 %v1991_v13, %v1990_v11 }
 0xeb9   : > { %v1839_v60 = vpop.f32.mrb[10].mxu1 }
 0xeba   : > { %v1988_v61 = vmul.f32 0.5, %v1839_v60  ;;  %v3503_v62 = vpop.f32.mrb[11].mxu1 }
 0xebc   : > { %3519 = vmatpush3.msra.mxu0 %v1988_v61 }
 0xebd   : > { %v3510_v0 = vpop.f32.mrb[12].mxu1  ;;  %3534 = vmatprep.subr.mxu0 %v3945_v6 }
 0xebe   : > { %v1909_v63 = vpop.f32.mrb[13].mxu1 }
 0xebf   : > { %v3705_v1 = vpack.c.bf16 %v3510_v0, %v1909_v63 }
 0xec1   : > { %3706 = vmatpush3.bf16.msra.mxu1 %v3705_v1 }
 0xec2   : > { %3707 = vmatprep.subr.bf16.mxu1 %v3946_v42 }
 0xec4   : > { %3516 = vmatmul.mubr.msk.f32.vlgmr.msra.gmra.mrb[14].mxu1 %vm356_vm3, %v1754_v59 }
 0xec5   : > { %3531 = vmatprep.mubr.msk.f32.mxu1 %vm3947_vm5, %v3945_v6  ;;  %3709 = vmatpush3.bf16.msra.mxu1 %v3708_v3 }
 0xec6   : > { %3710 = vmatprep.subr.bf16.mxu1 %v3946_v42 }
 0xec9   : > { %3712 = vmatpush3.bf16.msra.mxu1 %v3711_v5 }
 0xeca   : > { %3544 = vmatprep.subr.mxu1 %v3945_v6 }
 0xf97   : > { %v4200_v7 = vpop.f32.mrb[14].mxu1 }
 0xf98   : > { %v3517_v8 = vpop.f32.mrb[15].mxu1  ;;  %3521 = vmatmul.mubr.msk.f32.vlgmr.msra.gmra.mrb[10].mxu0 %vm272_vm0, %v4200_v7 }
 0xf99   : > { %3536 = vmatprep.mubr.msk.f32.mxu0 %vm3947_vm5, %v3945_v6 }
0x106b   : > { %v2064_v9 = vpop.f32.mrb[10].mxu0 }
0x106c   : > { %v3522_v10 = vpop.f32.mrb[11].mxu0  ;;  %3532 = vmatmul.mubr.msk.f32.vlgmr.msra.gmra.mrb[16].mxu1 %vm461_vm4, %v2064_v9 }
0x106d   : > { %3546 = vmatprep.mubr.msk.f32.mxu1 %vm3947_vm5, %v3945_v6 }
0x113f   : > { %v2141_v14 = vpop.f32.mrb[16].mxu1 }
0x1140   : > { %v2142_v15 = vadd.f32 %v3208_v12, %v2141_v14  ;;  %v3533_v16 = vpop.f32.mrb[17].mxu1 }
0x1142   : > { %v2145_v17 = vmul.f32 %v2142_v15, %v2142_v15 }
0x1144   : > { %v2146_v20 = vsel %vm461_vm4, %v2145_v17, 0.0  ;;  %v2644_v17 = vld [vmem:[#allocation2 + $0x1d0] sm:$0xff] }
0x1145   : > { %2147 = vadd.xlane.f32.xlu0 %v2146_v20  ;;  %v2645_v20 = vld [vmem:[#allocation2 + $0x1d8] sm:$0xff] }
0x11d2   : > { %v2148_v21 = vpop.xlane.xlu0 %2147 }
0x11d3   : > { %v2149_v22 = vmax.f32 %v2148_v21, 1e-24  ;;  %v2646_v21 = vld [vmem:[#allocation2 + $0x1e0] sm:$0xff] }
0x11d5   : > { %3833 = vrsqrt.f32 %v2149_v22  ;;  %v3720_v22 = vpack.c.bf16 %v2645_v20, %v2644_v17 }
0x11df   : > { %v3834_v23 = vpop.eup %3833 }
0x11e0   : > { %v2151_v24 = vmul.f32 %v3834_v23, %v2142_v15  ;;  %v2647_v23 = vld [vmem:[#allocation2 + $0x1e8] sm:$0xff] }
0x11e2   : > { %v2152_v25 = vmax.f32 %v2151_v24, 0.0  ;;  %v3723_v24 = vpack.c.bf16 %v2647_v23, %v2646_v21 }
0x11e4   : > { %v2153_v26 = vadd.f32 %v2152_v25, %v1988_v61 }
0x11e6   : > { %v2154_v27 = vsel %vm461_vm4, %v2153_v26, 0.0 }
0x11e7   : > { %2155 = vadd.xlane.f32.xlu0 %v2154_v27 }
0x1274   : > { %v2156_v29 = vpop.xlane.xlu0 %2155 }
0x1275   : > { %3535 = vmatpush3.msra.mxu0 %v2156_v29 }
0x1276   : > { %3537 = vmatmul.mubr.msk.f32.vlgmr.msra.gmra.mrb[12].mxu0 %vm272_vm0, %v4211_v28  ;;  %3539 = vmatprep.subr.mxu0 %v3945_v6 }
0x1277   : > { %3541 = vmatprep.mubr.msk.f32.mxu0 %vm3947_vm5, %v3945_v6 }
0x1349   : > { %v2226_v30 = vpop.f32.mrb[12].mxu0 }
0x134a   : > { %v2230_v34 = vmul.f32 0.015625, %v2226_v30  ;;  %v3538_v36 = vpop.f32.mrb[13].mxu0 }
0x134c   : > { %2233 = vperm.xlu0 %3791, %v2230_v34  }
0x13cb   : > { %v2234_v37 = vpop.permute.xlu0 %2233 }
0x13cc   : > { %v2236_v38 = vsub.f32 %v2153_v26, %v2234_v37 }
0x13ce   : > { %v2237_v39 = vmul.f32 %v2236_v38, %v2236_v38 }
0x13d0   : > { %v2238_v19 = vsel %vm461_vm4, %v2237_v39, 0.0 }
0x13d1   : > { %2239 = vadd.xlane.f32.xlu0 %v2238_v19 }
0x145e   : > { %v2240_v40 = vpop.xlane.xlu0 %2239 }
0x145f   : > { %3540 = vmatpush3.msra.mxu0 %v2240_v40 }
0x1460   : > { %3542 = vmatmul.mubr.msk.f32.vlgmr.msra.gmra.mrb[14].mxu0 %vm272_vm0, %v4211_v28  ;;  %3713 = vmatprep.subr.bf16.mxu0 %v3946_v42 }
0x1461   : > { %3557 = vmatprep.mubr.msk.f32.mxu0 %vm3947_vm5, %v3945_v6  ;;  %3715 = vmatpush3.bf16.msra.mxu0 %v3714_v35 }
0x1462   : > { %3716 = vmatprep.subr.bf16.mxu0 %v3946_v42 }
0x1465   : > { %3718 = vmatpush3.bf16.msra.mxu0 %v3717_v49 }
0x1466   : > { %3570 = vmatprep.subr.mxu0 %v3945_v6 }
0x1533   : > { %v2307_v18 = vpop.f32.mrb[14].mxu0 }
0x1534   : > { %v2311_v41 = vmul.f32 0.015625, %v2307_v18  ;;  %v3543_v43 = vpop.f32.mrb[15].mxu0 }
0x1536   : > { %v2312_v44 = vadd.f32 1e-05, %v2311_v41 }
0x1538   : > { %3835 = vrsqrt.f32 %v2312_v44 }
0x1542   : > { %v3836_v45 = vpop.eup %3835 }
0x1543   : > { %2316 = vperm.xlu1 %3792, %v3836_v45  }
0x15c2   : > { %v2317_v50 = vpop.permute.xlu1 %2316 }
0x15c3   : > { %v2319_v32 = vmul.f32 %v2317_v50, %v2236_v38 }
0x15c5   : > { %3545 = vmatpush3.msra.mxu1 %v2319_v32 }
0x15c6   : > { %3547 = vmatmul.mubr.msk.f32.vlgmr.msra.gmra.mrb[18].mxu1 %vm272_vm0, %v4200_v7  ;;  %3560 = vmatprep.subr.mxu1 %v3945_v6 }
0x15c7   : > { %3562 = vmatprep.mubr.msk.f32.mxu1 %vm3947_vm5, %v3945_v6 }
0x1699   : > { %v2391_v33 = vpop.f32.mrb[18].mxu1 }
0x169a   : > { %v3548_v51 = vpop.f32.mrb[19].mxu1  ;;  %3558 = vmatmul.mubr.msk.f32.vlgmr.msra.gmra.mrb[16].mxu0 %vm461_vm4, %v2391_v33 }
0x169b   : > { %3572 = vmatprep.mubr.msk.f32.mxu0 %vm3947_vm5, %v3945_v6 }
0x176d   : > { %v2468_v53 = vpop.f32.mrb[16].mxu0 }
0x176e   : > { %v2469_v54 = vadd.f32 %v3213_v52, %v2468_v53  ;;  %v3559_v55 = vpop.f32.mrb[17].mxu0 }
0x176f   : > { %v2968_v55 = vld [vmem:[#allocation2 + $0x200] sm:$0x3] }
0x1770   : > { %v2472_v56 = vmul.f32 %v2469_v54, %v2469_v54 }
0x1772   : > { %v2473_v57 = vsel %vm461_vm4, %v2472_v56, 0.0 }
0x1773   : > { %2474 = vadd.xlane.f32.xlu0 %v2473_v57 }
0x1800   : > { %v2475_v58 = vpop.xlane.xlu0 %2474 }
0x1801   : > { %v2476_v59 = vmax.f32 %v2475_v58, 1e-24 }
0x1803   : > { %3837 = vrsqrt.f32 %v2476_v59 }
0x180d   : > { %v3838_v60 = vpop.eup %3837 }
0x180e   : > { %v2478_v61 = vmul.f32 %v3838_v60, %v2469_v54 }
0x1810   : > { %v2479_v62 = vmax.f32 %v2478_v61, 0.0 }
0x1812   : > { %v2480_v0 = vadd.f32 %v2479_v62, %v2319_v32 }
0x1814   : > { %v2481_v63 = vsel %vm461_vm4, %v2480_v0, 0.0 }
0x1815   : > { %2482 = vadd.xlane.f32.xlu0 %v2481_v63 }
0x18a2   : > { %v2483_v1 = vpop.xlane.xlu0 %2482 }
0x18a3   : > { %3561 = vmatpush3.msra.mxu1 %v2483_v1 }
0x18a4   : > { %3563 = vmatmul.mubr.msk.f32.vlgmr.msra.gmra.mrb[20].mxu1 %vm272_vm0, %v4211_v28  ;;  %3565 = vmatprep.subr.mxu1 %v3945_v6 }
0x18a5   : > { %3567 = vmatprep.mubr.msk.f32.mxu1 %vm3947_vm5, %v3945_v6 }
0x1977   : > { %v2550_v11 = vpop.f32.mrb[20].mxu1 }
0x1978   : > { %v2554_v13 = vmul.f32 0.015625, %v2550_v11  ;;  %v3564_v2 = vpop.f32.mrb[21].mxu1 }
0x197a   : > { %2557 = vperm.xlu0 %3791, %v2554_v13  }
0x19f9   : > { %v2558_v3 = vpop.permute.xlu0 %2557 }
0x19fa   : > { %v2560_v4 = vsub.f32 %v2480_v0, %v2558_v3 }
0x19fc   : > { %v2561_v5 = vmul.f32 %v2560_v4, %v2560_v4 }
0x19fe   : > { %v2562_v8 = vsel %vm461_vm4, %v2561_v5, 0.0 }
0x19ff   : > { %2563 = vadd.xlane.f32.xlu1 %v2562_v8 }
0x1a8c   : > { %v2564_v9 = vpop.xlane.xlu1 %2563 }
0x1a8d   : > { %3566 = vmatpush3.msra.mxu1 %v2564_v9 }
0x1a8e   : > { %3568 = vmatmul.mubr.msk.f32.vlgmr.msra.gmra.mrb[22].mxu1 %vm272_vm0, %v4211_v28  ;;  %3719 = vmatprep.subr.bf16.mxu1 %v3946_v42 }
0x1a8f   : > { %3583 = vmatprep.mubr.msk.f32.mxu1 %vm3947_vm5, %v3945_v6  ;;  %3721 = vmatpush3.bf16.msra.mxu1 %v3720_v22 }
0x1a90   : > { %3722 = vmatprep.subr.bf16.mxu1 %v3946_v42  ;;  %v3218_v42 = vld [vmem:[#allocation2 + $0x1f0] ss:$0 sm:$0xff] }
0x1a93   : > { %3724 = vmatpush3.bf16.msra.mxu1 %v3723_v24 }
0x1a94   : > { %3596 = vmatprep.subr.mxu1 %v3945_v6 }
0x1b61   : > { %v2631_v10 = vpop.f32.mrb[22].mxu1 }
0x1b62   : > { %v2635_v12 = vmul.f32 0.015625, %v2631_v10  ;;  %v3569_v14 = vpop.f32.mrb[23].mxu1 }
0x1b64   : > { %v2636_v15 = vadd.f32 1e-05, %v2635_v12 }
0x1b66   : > { %3839 = vrsqrt.f32 %v2636_v15 }
0x1b70   : > { %v3840_v16 = vpop.eup %3839 }
0x1b71   : > { %2640 = vperm.xlu0 %3791, %v3840_v16  }
0x1bf0   : > { %v2641_v25 = vpop.permute.xlu0 %2640 }
0x1bf1   : > { %v2643_v26 = vmul.f32 %v2641_v25, %v2560_v4 }
0x1bf3   : > { %3571 = vmatpush3.msra.mxu0 %v2643_v26 }
0x1bf4   : > { %3573 = vmatmul.mubr.msk.f32.vlgmr.msra.gmra.mrb[18].mxu0 %vm272_vm0, %v4200_v7  ;;  %3586 = vmatprep.subr.mxu0 %v3945_v6 }
0x1bf5   : > { %3588 = vmatprep.mubr.msk.f32.mxu0 %vm3947_vm5, %v3945_v6 }
0x1cc7   : > { %v2715_v27 = vpop.f32.mrb[18].mxu0 }
0x1cc8   : > { %v3574_v29 = vpop.f32.mrb[19].mxu0  ;;  %3584 = vmatmul.mubr.msk.f32.vlgmr.msra.gmra.mrb[24].mxu1 %vm461_vm4, %v2715_v27 }
0x1cc9   : > { %3598 = vmatprep.mubr.msk.f32.mxu1 %vm3947_vm5, %v3945_v6 }
0x1d9b   : > { %v2792_v30 = vpop.f32.mrb[24].mxu1 }
0x1d9c   : > { %v2793_v34 = vadd.f32 %v3218_v42, %v2792_v30  ;;  %v3585_v36 = vpop.f32.mrb[25].mxu1 }
0x1d9e   : > { %v2796_v37 = vmul.f32 %v2793_v34, %v2793_v34 }
0x1da0   : > { %v2797_v38 = vsel %vm461_vm4, %v2796_v37, 0.0 }
0x1da1   : > { %2798 = vadd.xlane.f32.xlu0 %v2797_v38 }
0x1e2e   : > { %v2799_v7 = vpop.xlane.xlu0 %2798 }
0x1e2f   : > { %v2800_v39 = vmax.f32 %v2799_v7, 1e-24 }
0x1e31   : > { %3841 = vrsqrt.f32 %v2800_v39 }
0x1e3b   : > { %v3842_v19 = vpop.eup %3841 }
0x1e3c   : > { %v2802_v40 = vmul.f32 %v3842_v19, %v2793_v34 }
0x1e3e   : > { %v2803_v18 = vmax.f32 %v2802_v40, 0.0 }
0x1e40   : > { %v2804_v41 = vadd.f32 %v2803_v18, %v2643_v26 }
0x1e42   : > { %v2805_v43 = vsel %vm461_vm4, %v2804_v41, 0.0 }
0x1e43   : > { %2806 = vadd.xlane.f32.xlu1 %v2805_v43 }
0x1ed0   : > { %v2807_v44 = vpop.xlane.xlu1 %2806 }
0x1ed1   : > { %3587 = vmatpush3.msra.mxu0 %v2807_v44 }
0x1ed2   : > { %3589 = vmatmul.mubr.msk.f32.vlgmr.msra.gmra.mrb[20].mxu0 %vm272_vm0, %v4211_v28  ;;  %3591 = vmatprep.subr.mxu0 %v3945_v6 }
0x1ed3   : > { %3593 = vmatprep.mubr.msk.f32.mxu0 %vm3947_vm5, %v3945_v6 }
0x1fa5   : > { %v2874_v45 = vpop.f32.mrb[20].mxu0 }
0x1fa6   : > { %v2878_v46 = vmul.f32 0.015625, %v2874_v45  ;;  %v3590_v47 = vpop.f32.mrb[21].mxu0 }
0x1fa8   : > { %2881 = vperm.xlu1 %3792, %v2878_v46  }
0x2027   : > { %v2882_v31 = vpop.permute.xlu1 %2881 }
0x2028   : > { %v2884_v35 = vsub.f32 %v2804_v41, %v2882_v31 }
0x202a   : > { %v2885_v48 = vmul.f32 %v2884_v35, %v2884_v35 }
0x202c   : > { %v2886_v49 = vsel %vm461_vm4, %v2885_v48, 0.0 }
0x202d   : > { %2887 = vadd.xlane.f32.xlu0 %v2886_v49 }
0x20ba   : > { %v2888_v50 = vpop.xlane.xlu0 %2887 }
0x20bb   : > { %3592 = vmatpush3.msra.mxu0 %v2888_v50 }
0x20bc   : > { %3594 = vmatmul.mubr.msk.f32.vlgmr.msra.gmra.mrb[22].mxu0 %vm272_vm0, %v4211_v28 }
0x218f   : > { %v2955_v32 = vpop.f32.mrb[22].mxu0 }
0x2190   : > { %v2959_v33 = vmul.f32 0.015625, %v2955_v32  ;;  %v3595_v6 = vpop.f32.mrb[23].mxu0 }
0x2192   : > { %v2960_v51 = vadd.f32 1e-05, %v2959_v33 }
0x2194   : > { %3843 = vrsqrt.f32 %v2960_v51 }
0x219e   : > { %v3844_v52 = vpop.eup %3843 }
0x219f   : > { %2964 = vperm.xlu0 %3791, %v3844_v52  }
0x221e   : > { %v2965_v53 = vpop.permute.xlu0 %2964 }
0x221f   : > { %v2967_v54 = vmul.f32 %v2965_v53, %v2884_v35 }
0x2221   : > { %3597 = vmatpush3.msra.mxu1 %v2967_v54 }
0x2222   : > { %3599 = vmatmul.mubr.msk.f32.vlgmr.msra.gmra.mrb[26].mxu1 %vm272_vm0, %v2968_v55 }
0x22f5   : > { %v3038_v28 = vpop.f32.mrb[26].mxu1 }
0x22f6   : > { %3043 = vst.msk [vmem:[%s235_s14] sm:$0x3] %vm3042_vm6, %v3038_v28  ;;  %v3600_v56 = vpop.f32.mrb[27].mxu1 }
0x22f7   : > { %3886 = shalt.err (!%p3883_p7)
}
0x22f8   : > { %s3887_s6 = scalar_lea.hbm %s4273_s28, 32  ;;  %s3891_s9 = scalar_lea.hbm %s4319_s4, 128 }
0x22f9   : > { %p3888_p8 = scmp.ne.s32.totalorder %s4273_s28, %s3887_s6  ;;  %p3892_p1 = scmp.lt.u32.totalorder %s4273_s28, %s4319_s4 }
0x22fa   : > { %p3893_p0 = scmp.lt.u32.totalorder %s3891_s9, %s3887_s6  ;;  %p3895_p6 = scmp.lt.u32.totalorder %s3887_s6, %s4273_s28 }
0x22fb   : > { %p3889_p11 = pnand %p3888_p8, %p4330_p9 }
0x22fc   : > { %p3894_p5 = por %p3893_p0, %p3892_p1 }
0x22fd   : > { %p3890_p13 = pneg %p3889_p11 }
0x22fe   : > { %p3896_p10 = por %p3895_p6, %p3894_p5 }
0x2300   : > { %p3897_p12 = pnand %p3896_p10, %p3890_p13 }
0x2302   : > { %3900 = shalt.err (!%p3897_p12)
}
0x2303   : > { %3739 = dma.vmem_to_hbm [thread:$0]  (%p4330_p9), %s4275_s20, 32, %s4273_s28, %s3045_s29  }
0x2304 PF: > { %p3751_p2 = scmp.ge.s32.totalorder %s3939_s18, 2  ;;  %s3070_s12 = sand.u32 1, %s3927_s15  }
0x2305   : > { %p4331_p3 = scmp.ne.s32.totalorder %s4324_s26, 0  ;;  %s3071_s13 = scalar_lea.sflag [#allocation4], %s3070_s12 }
0x2307   : > { %p3746_p4 = pnand %p3751_p2, %p4331_p3 }
0x2309   : > { %3922 = dma.done.wait (!%p3746_p4), %s3071_s13, 32  }
0x230a   : > { %3924 = vsyncadd (!%p3746_p4), %s3071_s13, 4294967264  ;;  %p15_p7 = scmp.ge.s32.totalorder %s3999_s21, 6   ;;  %s4332_s15 = smov %s3931_s16 }
0x230b   : > { %s4333_s16 = smov %s3935_s17  ;;  %s4334_s17 = smov %s4010_s24 }
0x230c   : > { %s4335_s18 = smov %s3999_s21  ;;  %17 = sbr.rel (!%p15_p7) target bundleno = 4 (0x4), region = 82 }
0x2313   :  { %3076 = vsyncpa [#allocation3], 1 }
0x2314   :  { %3078 = vsyncpa [#allocation3 + $0x1], 1 }
0x2315   :  { %3079 = vsyncpa [#allocation4], 1 }
0x2316   :  { %3081 = vsyncpa [#allocation4 + $0x1], 1 }

</bundles_post_ra>
